<compile_context>
chip_gen: v6e
topology: v6e:2x2x1
jax: 0.10.0
libtpu: 0.0.40
codegen_flags: <defaults>
</compile_context>

<pallas_src>
import functools

import numpy as np
import jax
import jax.numpy as jnp
from jax.experimental import pallas as pl
from jax.experimental.pallas import tpu as pltpu


_NUM_STATS = 16    # Sp(3) + Sq(3) + cross(9) + sum-of-squares(1)
_OUT_LANES = 128   # lane-dense output tile


def _kabsch_stats_kernel(pred_ref, true_ref, out_ref):
    """One grid step = LB ligands. Emits 16 raw per-ligand moments (lanes 0..15)."""
    # pred_ref/true_ref: (3, LB, N_pad) f32 ; out_ref: (LB, 128) f32
    px, py, pz = pred_ref[0], pred_ref[1], pred_ref[2]
    qx, qy, qz = true_ref[0], true_ref[1], true_ref[2]

    def _rsum(v):
        return jnp.sum(v, axis=-1, keepdims=True)          # (LB, 1)
    # TODO(synk): for n_pad > 128, pre-add the 128-lane tiles with VPU adds
    # before one XLU reduce per statistic if the XLU slot ever saturates (v6e/v7x).

    cols = [
        _rsum(px), _rsum(py), _rsum(pz),                    # Sp   (lanes 0..2)
        _rsum(qx), _rsum(qy), _rsum(qz),                    # Sq   (lanes 3..5)
        _rsum(px * qx), _rsum(px * qy), _rsum(px * qz),     # Σ p_i q_j (lanes 6..14)
        _rsum(py * qx), _rsum(py * qy), _rsum(py * qz),
        _rsum(pz * qx), _rsum(pz * qy), _rsum(pz * qz),
        _rsum(px * px + py * py + pz * pz                   # Σ|p|²+|q|²  (lane 15)
              + qx * qx + qy * qy + qz * qz),
    ]
    lb = out_ref.shape[0]
    fill = jnp.zeros((lb, _OUT_LANES - _NUM_STATS), dtype=out_ref.dtype)
    # Single lane-dense unmasked full-tile store (no zero-init + per-column writes).
    out_ref[...] = jnp.concatenate(cols + [fill], axis=-1)


def _round_up(x, m):
    return ((x + m - 1) // m) * m


def _vmem_capacity_bytes():
    """Generation-aware VMEM capacity (v5e/v6e: 128 MiB, v7x: 64 MiB)."""
    try:
        info = pltpu.get_tpu_info()
        cap = int(getattr(info, "vmem_capacity_bytes", 0) or 0)
        if cap > 0:
            return cap
    except Exception:
        pass
    return 64 * 1024 * 1024   # conservative fallback (v7x per-TC VMEM)


def _choose_lb(num_ligs, n_pad):
    """Ligands per grid step: biggest block that keeps pipelined VMEM < ~half capacity."""
    budget = _vmem_capacity_bytes() // 2
    per_row = (2 * 2 * 3 * n_pad * 4      # 2 inputs x 2 pipeline buffers x 3 planes
               + 4 * n_pad * 4            # elementwise temporaries (estimate)
               + 2 * _OUT_LANES * 4)      # double-buffered output row
    cap = max(8, (budget // per_row) // 8 * 8)
    lb = min(_round_up(max(num_ligs, 1), 8), cap, 2048)
    # Keep >= 2 grid steps for larger batches: the "parallel" grid axis is what
    # shards work across the two v7x TensorCores (negligible cost on v5e/v6e).
    if num_ligs >= 16:
        lb = min(lb, _round_up((num_ligs + 1) // 2, 8))
    return max(8, (lb // 8) * 8)


@functools.partial(jax.jit, static_argnames=("num_ligs", "lb"))
def _kabsch_rmsds_bucket(pred_packed, true_packed, lens, *, num_ligs, lb):
    """Per-ligand RMSDs for one packed bucket of ligands."""
    _, b_pad, n_pad = pred_packed.shape
    grid = (b_pad // lb,)

    blk_bytes = 2 * 2 * 3 * lb * n_pad * 4 + 2 * lb * _OUT_LANES * 4
    vmem_cap = _vmem_capacity_bytes()
    vmem_limit = int(min(vmem_cap,
                         max(32 * 1024 * 1024, 2 * blk_bytes + 8 * 1024 * 1024)))

    stats = pl.pallas_call(
        _kabsch_stats_kernel,
        out_shape=jax.ShapeDtypeStruct((b_pad, _OUT_LANES), jnp.float32),
        grid_spec=pltpu.PrefetchScalarGridSpec(
            num_scalar_prefetch=0,
            grid=grid,
            in_specs=[
                pl.BlockSpec((3, lb, n_pad), lambda i: (0, i, 0)),
                pl.BlockSpec((3, lb, n_pad), lambda i: (0, i, 0)),
            ],
            out_specs=pl.BlockSpec((lb, _OUT_LANES), lambda i: (i, 0)),
        ),
        compiler_params=pltpu.CompilerParams(
            dimension_semantics=("parallel",),
            vmem_limit_bytes=vmem_limit),
    )(pred_packed, true_packed)

    st = stats[:num_ligs]
    n = lens[:num_ligs].astype(jnp.float32)                 # (L,)
    sp = st[:, 0:3]
    sq = st[:, 3:6]
    cross = st[:, 6:15].reshape(num_ligs, 3, 3)
    ssq = st[:, 15]

    # Centered cross-covariance and centered total energy (all O(L) work).
    a = cross - (sp[:, :, None] * sq[:, None, :]) / n[:, None, None]
    e0 = ssq - (jnp.sum(sp * sp, axis=-1) + jnp.sum(sq * sq, axis=-1)) / n

    # Kabsch identity: rmsd^2 = (E0 - 2*(s1 + s2 + sign(det A)*s3)) / n
    s = jnp.linalg.svd(a, compute_uv=False)                 # singular values, descending
    d = jnp.sign(jnp.linalg.det(a))
    tr = s[:, 0] + s[:, 1] + d * s[:, 2]
    msd = jnp.maximum(e0 - 2.0 * tr, 0.0) / n
    return jnp.sqrt(msd)


def kabsch_rmsd(ligs_coords_pred, ligs_coords):
    """Mirror of KabschRMSD.forward for lists of (N_i, 3) coordinate arrays."""
    assert len(ligs_coords_pred) == len(ligs_coords) and len(ligs_coords) > 0

    # Bucket ligands by padded atom count so HBM traffic scales with real atoms
    # (one oversized ligand no longer inflates every other ligand's padding).
    buckets = {}
    for p, t in zip(ligs_coords_pred, ligs_coords):
        p = np.asarray(p, dtype=np.float32)
        t = np.asarray(t, dtype=np.float32)
        assert p.shape == t.shape and p.ndim == 2 and p.shape[1] == 3
        n_pad = _round_up(max(p.shape[0], 1), 128)
        buckets.setdefault(n_pad, []).append((p, t))

    per_lig_rmsds = []
    for n_pad, items in sorted(buckets.items()):
        num_ligs = len(items)
        lb = _choose_lb(num_ligs, n_pad)
        b_pad = _round_up(num_ligs, lb)

        pred_np = np.zeros((3, b_pad, n_pad), dtype=np.float32)
        true_np = np.zeros((3, b_pad, n_pad), dtype=np.float32)
        lens_np = np.ones((b_pad,), dtype=np.int32)     # padded rows -> 1 (no div by 0)
        for b, (p, t) in enumerate(items):
            n = p.shape[0]
            # Pre-shift each set by its own first atom so the single-pass raw
            # moments never cancel catastrophically for large absolute coords;
            # Kabsch RMSD is invariant to independent translations of either set.
            pred_np[:, b, :n] = (p - p[0:1]).T
            true_np[:, b, :n] = (t - t[0:1]).T
            lens_np[b] = n

        rmsds = _kabsch_rmsds_bucket(
            jnp.asarray(pred_np), jnp.asarray(true_np), jnp.asarray(lens_np),
            num_ligs=num_ligs, lb=lb)
        per_lig_rmsds.append(rmsds)

    return jnp.mean(jnp.concatenate(per_lig_rmsds))


def _kabsch_rmsd_reference(ligs_coords_pred, ligs_coords):
    """Direct JAX transcription of the PyTorch module (explicit rotation)."""
    rmsds = []
    for p, t in zip(ligs_coords_pred, ligs_coords):
        p = jnp.asarray(p, jnp.float32)
        t = jnp.asarray(t, jnp.float32)
        pm = p.mean(axis=0, keepdims=True)
        tm = t.mean(axis=0, keepdims=True)
        a = (p - pm).T @ (t - tm)
        u, _, vt = jnp.linalg.svd(a)
        sign = jnp.sign(jnp.linalg.det(a))
        corr = jnp.diag(jnp.stack([jnp.ones(()), jnp.ones(()), sign]))
        rot = u @ corr @ vt
        trans = pm - (rot @ tm.T).T
        t_aligned = (rot @ t.T).T + trans
        rmsds.append(jnp.sqrt(jnp.mean(jnp.sum((p - t_aligned) ** 2, axis=1))))
    return jnp.mean(jnp.stack(rmsds))


if __name__ == "__main__":
    key = jax.random.PRNGKey(0)
    k1, k2, k3, k4 = jax.random.split(key, 4)

    # Two "ligands" with different atom counts, 3D coords.
    pred_list = [
        jax.random.normal(k1, (10, 3), dtype=jnp.float32),
        jax.random.normal(k2, (7, 3), dtype=jnp.float32),
    ]
    true_list = [
        jax.random.normal(k3, (10, 3), dtype=jnp.float32),
        jax.random.normal(k4, (7, 3), dtype=jnp.float32),
    ]

    out = kabsch_rmsd(pred_list, true_list)
    out = jax.block_until_ready(out)

    ref = _kabsch_rmsd_reference(pred_list, true_list)
    assert jnp.allclose(out, ref, rtol=1e-3, atol=1e-3), (out, ref)
    print("KERNEL_OK")
</pallas_src>

<mosaic_0001>
module attributes {stable_mosaic.version = 11 : i64} {
  func.func @_kabsch_stats_kernel(%arg0: i32, %arg1: memref<3x8x128xf32, #tpu.memory_space<vmem>>, %arg2: memref<3x8x128xf32, #tpu.memory_space<vmem>>, %arg3: memref<8x128xf32, #tpu.memory_space<vmem>>) attributes {dimension_semantics = [#tpu.dimension_semantics<parallel>], iteration_bounds = array<i64: 1>, scalar_prefetch = 0 : i64, scratch_operands = 0 : i64, tpu.core_type = #tpu.core_type<tc>, window_params = [{transform_indices = @transform_0, window_bounds = array<i64: 3, 8, 128>}, {transform_indices = @transform_1, window_bounds = array<i64: 3, 8, 128>}, {transform_indices = @transform_2, window_bounds = array<i64: 8, 128>}]} {
    %c0 = arith.constant 0 : index
    %c0_0 = arith.constant 0 : index
    %c0_1 = arith.constant 0 : index
    %0 = vector.load %arg1[%c0, %c0_0, %c0_1] : memref<3x8x128xf32, #tpu.memory_space<vmem>>, vector<1x8x128xf32>
    %1 = vector.shape_cast %0 : vector<1x8x128xf32> to vector<8x128xf32>
    %c1 = arith.constant 1 : index
    %c0_2 = arith.constant 0 : index
    %c0_3 = arith.constant 0 : index
    %2 = vector.load %arg1[%c1, %c0_2, %c0_3] : memref<3x8x128xf32, #tpu.memory_space<vmem>>, vector<1x8x128xf32>
    %3 = vector.shape_cast %2 : vector<1x8x128xf32> to vector<8x128xf32>
    %c2 = arith.constant 2 : index
    %c0_4 = arith.constant 0 : index
    %c0_5 = arith.constant 0 : index
    %4 = vector.load %arg1[%c2, %c0_4, %c0_5] : memref<3x8x128xf32, #tpu.memory_space<vmem>>, vector<1x8x128xf32>
    %5 = vector.shape_cast %4 : vector<1x8x128xf32> to vector<8x128xf32>
    %c0_6 = arith.constant 0 : index
    %c0_7 = arith.constant 0 : index
    %c0_8 = arith.constant 0 : index
    %6 = vector.load %arg2[%c0_6, %c0_7, %c0_8] : memref<3x8x128xf32, #tpu.memory_space<vmem>>, vector<1x8x128xf32>
    %7 = vector.shape_cast %6 : vector<1x8x128xf32> to vector<8x128xf32>
    %c1_9 = arith.constant 1 : index
    %c0_10 = arith.constant 0 : index
    %c0_11 = arith.constant 0 : index
    %8 = vector.load %arg2[%c1_9, %c0_10, %c0_11] : memref<3x8x128xf32, #tpu.memory_space<vmem>>, vector<1x8x128xf32>
    %9 = vector.shape_cast %8 : vector<1x8x128xf32> to vector<8x128xf32>
    %c2_12 = arith.constant 2 : index
    %c0_13 = arith.constant 0 : index
    %c0_14 = arith.constant 0 : index
    %10 = vector.load %arg2[%c2_12, %c0_13, %c0_14] : memref<3x8x128xf32, #tpu.memory_space<vmem>>, vector<1x8x128xf32>
    %11 = vector.shape_cast %10 : vector<1x8x128xf32> to vector<8x128xf32>
    %cst = arith.constant dense<0.000000e+00> : vector<8xf32>
    %12 = vector.multi_reduction <add>, %1, %cst [1] : vector<8x128xf32> to vector<8xf32>
    %13 = vector.shape_cast %12 : vector<8xf32> to vector<8x1xf32>
    %cst_15 = arith.constant dense<0.000000e+00> : vector<8xf32>
    %14 = vector.multi_reduction <add>, %3, %cst_15 [1] : vector<8x128xf32> to vector<8xf32>
    %15 = vector.shape_cast %14 : vector<8xf32> to vector<8x1xf32>
    %cst_16 = arith.constant dense<0.000000e+00> : vector<8xf32>
    %16 = vector.multi_reduction <add>, %5, %cst_16 [1] : vector<8x128xf32> to vector<8xf32>
    %17 = vector.shape_cast %16 : vector<8xf32> to vector<8x1xf32>
    %cst_17 = arith.constant dense<0.000000e+00> : vector<8xf32>
    %18 = vector.multi_reduction <add>, %7, %cst_17 [1] : vector<8x128xf32> to vector<8xf32>
    %19 = vector.shape_cast %18 : vector<8xf32> to vector<8x1xf32>
    %cst_18 = arith.constant dense<0.000000e+00> : vector<8xf32>
    %20 = vector.multi_reduction <add>, %9, %cst_18 [1] : vector<8x128xf32> to vector<8xf32>
    %21 = vector.shape_cast %20 : vector<8xf32> to vector<8x1xf32>
    %cst_19 = arith.constant dense<0.000000e+00> : vector<8xf32>
    %22 = vector.multi_reduction <add>, %11, %cst_19 [1] : vector<8x128xf32> to vector<8xf32>
    %23 = vector.shape_cast %22 : vector<8xf32> to vector<8x1xf32>
    %24 = arith.mulf %1, %7 : vector<8x128xf32>
    %cst_20 = arith.constant dense<0.000000e+00> : vector<8xf32>
    %25 = vector.multi_reduction <add>, %24, %cst_20 [1] : vector<8x128xf32> to vector<8xf32>
    %26 = vector.shape_cast %25 : vector<8xf32> to vector<8x1xf32>
    %27 = arith.mulf %1, %9 : vector<8x128xf32>
    %cst_21 = arith.constant dense<0.000000e+00> : vector<8xf32>
    %28 = vector.multi_reduction <add>, %27, %cst_21 [1] : vector<8x128xf32> to vector<8xf32>
    %29 = vector.shape_cast %28 : vector<8xf32> to vector<8x1xf32>
    %30 = arith.mulf %1, %11 : vector<8x128xf32>
    %cst_22 = arith.constant dense<0.000000e+00> : vector<8xf32>
    %31 = vector.multi_reduction <add>, %30, %cst_22 [1] : vector<8x128xf32> to vector<8xf32>
    %32 = vector.shape_cast %31 : vector<8xf32> to vector<8x1xf32>
    %33 = arith.mulf %3, %7 : vector<8x128xf32>
    %cst_23 = arith.constant dense<0.000000e+00> : vector<8xf32>
    %34 = vector.multi_reduction <add>, %33, %cst_23 [1] : vector<8x128xf32> to vector<8xf32>
    %35 = vector.shape_cast %34 : vector<8xf32> to vector<8x1xf32>
    %36 = arith.mulf %3, %9 : vector<8x128xf32>
    %cst_24 = arith.constant dense<0.000000e+00> : vector<8xf32>
    %37 = vector.multi_reduction <add>, %36, %cst_24 [1] : vector<8x128xf32> to vector<8xf32>
    %38 = vector.shape_cast %37 : vector<8xf32> to vector<8x1xf32>
    %39 = arith.mulf %3, %11 : vector<8x128xf32>
    %cst_25 = arith.constant dense<0.000000e+00> : vector<8xf32>
    %40 = vector.multi_reduction <add>, %39, %cst_25 [1] : vector<8x128xf32> to vector<8xf32>
    %41 = vector.shape_cast %40 : vector<8xf32> to vector<8x1xf32>
    %42 = arith.mulf %5, %7 : vector<8x128xf32>
    %cst_26 = arith.constant dense<0.000000e+00> : vector<8xf32>
    %43 = vector.multi_reduction <add>, %42, %cst_26 [1] : vector<8x128xf32> to vector<8xf32>
    %44 = vector.shape_cast %43 : vector<8xf32> to vector<8x1xf32>
    %45 = arith.mulf %5, %9 : vector<8x128xf32>
    %cst_27 = arith.constant dense<0.000000e+00> : vector<8xf32>
    %46 = vector.multi_reduction <add>, %45, %cst_27 [1] : vector<8x128xf32> to vector<8xf32>
    %47 = vector.shape_cast %46 : vector<8xf32> to vector<8x1xf32>
    %48 = arith.mulf %5, %11 : vector<8x128xf32>
    %cst_28 = arith.constant dense<0.000000e+00> : vector<8xf32>
    %49 = vector.multi_reduction <add>, %48, %cst_28 [1] : vector<8x128xf32> to vector<8xf32>
    %50 = vector.shape_cast %49 : vector<8xf32> to vector<8x1xf32>
    %51 = arith.mulf %1, %1 : vector<8x128xf32>
    %52 = arith.mulf %3, %3 : vector<8x128xf32>
    %53 = arith.addf %51, %52 : vector<8x128xf32>
    %54 = arith.mulf %5, %5 : vector<8x128xf32>
    %55 = arith.addf %53, %54 : vector<8x128xf32>
    %56 = arith.mulf %7, %7 : vector<8x128xf32>
    %57 = arith.addf %55, %56 : vector<8x128xf32>
    %58 = arith.mulf %9, %9 : vector<8x128xf32>
    %59 = arith.addf %57, %58 : vector<8x128xf32>
    %60 = arith.mulf %11, %11 : vector<8x128xf32>
    %61 = arith.addf %59, %60 : vector<8x128xf32>
    %cst_29 = arith.constant dense<0.000000e+00> : vector<8xf32>
    %62 = vector.multi_reduction <add>, %61, %cst_29 [1] : vector<8x128xf32> to vector<8xf32>
    %63 = vector.shape_cast %62 : vector<8xf32> to vector<8x1xf32>
    %cst_30 = arith.constant 0.000000e+00 : f32
    %64 = vector.broadcast %cst_30 : f32 to vector<8x112xf32>
    %65 = tpu.concatenate %13, %15, %17, %19, %21, %23, %26, %29, %32, %35, %38, %41, %44, %47, %50, %63 in 1 : vector<8x1xf32>, vector<8x1xf32>, vector<8x1xf32>, vector<8x1xf32>, vector<8x1xf32>, vector<8x1xf32>, vector<8x1xf32>, vector<8x1xf32>, vector<8x1xf32>, vector<8x1xf32>, vector<8x1xf32>, vector<8x1xf32>, vector<8x1xf32>, vector<8x1xf32>, vector<8x1xf32>, vector<8x1xf32> -> vector<8x16xf32>
    %66 = tpu.concatenate %65, %64 in 1 : vector<8x16xf32>, vector<8x112xf32> -> vector<8x128xf32>
    %c0_31 = arith.constant 0 : index
    %c0_32 = arith.constant 0 : index
    %67 = vector.load %arg3[%c0_31, %c0_32] : memref<8x128xf32, #tpu.memory_space<vmem>>, vector<8x128xf32>
    tpu.vector_store %arg3[%c0_31, %c0_32], %66 {strides = array<i32>} : memref<8x128xf32, #tpu.memory_space<vmem>>, vector<8x128xf32>,
    return
  }
  func.func @transform_0(%arg0: i32) -> (i32, i32, i32) {
    %c0_i32 = arith.constant 0 : i32
    %c0_i32_0 = arith.constant 0 : i32
    %c0_i32_1 = arith.constant 0 : i32
    return %c0_i32, %arg0, %c0_i32_0 : i32, i32, i32
  }
  func.func @transform_1(%arg0: i32) -> (i32, i32, i32) {
    %c0_i32 = arith.constant 0 : i32
    %c0_i32_0 = arith.constant 0 : i32
    %c0_i32_1 = arith.constant 0 : i32
    return %c0_i32, %arg0, %c0_i32_0 : i32, i32, i32
  }
  func.func @transform_2(%arg0: i32) -> (i32, i32) {
    %c0_i32 = arith.constant 0 : i32
    %c0_i32_0 = arith.constant 0 : i32
    return %arg0, %c0_i32 : i32, i32
  }
}

</mosaic_0001>

<bundles_post_ra>
// kernel: custom-call.47
= control target key start
LH: loop header
LB: loop body
LE: loop exit
PB: predicated region body
PF: predicated region fallthrough
CT: control target
= control target key end

     0   :  { %s651_s9 = smov 0   ;;  %s653_s10 = smov 0   ;;  %s801_s0 = inlined_call_operand.vmem [shape: f32[2,6,3], index: 0, kind: input, shape index: {}]   ;;  %s802_s1 = inlined_call_operand.vmem [shape: f32[2,6,3], index: 1, kind: output, shape index: {0}]   ;;  %s803_s2 = inlined_call_operand.vmem [shape: f32[2,3], index: 2, kind: output, shape index: {1}]  }
   0x1   :  { %s655_s11 = smov 0   ;;  %s657_s12 = smov 0  }
   0x2   :  { %s659_s13 = smov 0  }
   0x3 LB: > { %s28_s14 = sadd.s32 1, %s624_s12  ;;  %s506_s15 = sadd.s32 4294967295, %s628_s13   ;;  %s628_s13 = sphi %s659_s13, %s9_s13   ;;  %s624_s12 = sphi %s657_s12, %s810_s12   ;;  %s620_s11 = sphi %s655_s11, %s809_s11   ;;  %s616_s10 = sphi %s653_s10, %s808_s10   ;;  %s612_s9 = sphi %s651_s9, %s807_s9  }
   0x4   : > { %p30_p0 = scmp.ge.s32.totalorder %s28_s14, 2  ;;  %s33_s16 = ssub.s32 0, %s624_s12 }
   0x5   : > { %s508_s17 = smin.u32 %s624_s12, %s33_s16  ;;  %p57_p1 = scmp.ne.s32.totalorder %s616_s10, %s612_s9 }
   0x6   : > { %s812_s14 = smov (%p30_p0, %s28_s14), 0  ;;  %s35_s18 = sshrl.u32 %s508_s17, 3 }
   0x7   : > { %s39_s19 = ssub.s32 0, %s812_s14  ;;  %p58_p2 = scmp.eq.s32.totalorder %s506_s15, 1 }
   0x8   : > { %s509_s20 = smin.u32 %s39_s19, %s812_s14  ;;  %s47_s24 = sadd.s32 1, %s616_s10 }
   0x9   : > { %s41_s21 = sshrl.u32 %s509_s20, 3  ;;  %p686_p3 = por %p58_p2, %p57_p1 }
   0xa   : > { %s44_s23 = ssub.s32 %s35_s18, %s41_s21  ;;  %p511_p5 = scmp.ge.s32.totalorder %s628_s13, 2 }
   0xb   : > { %p45_p4 = scmp.eq.s32.totalorder %s44_s23, 0  ;;  %s82_s26 = sand.u32 (!%p511_p5), 1, %s628_s13  }
   0xc   : > { %80 = sbr.rel (%p511_p5) target bundleno = 19 (0x13), region = 16  ;;  %s513_s27 = sshll.u32 (!%p511_p5), %s624_s12, 3 }
   0xd   : > { %s692_s25 = scalar_select %p45_p4, %s616_s10, %s47_s24  }
   0xe   : > { %s512_s28 = sshll.u32 (!%p511_p5), %s82_s26, 3  ;;  %s88_s3 = scalar_lea.vmem (!%p511_p5), %s801_s0, %s513_s27 }
   0xf   : > { %s84_s4 = scalar_lea.vmem (!%p511_p5), [#allocation0], %s512_s28 }
  0x11   : > { %v117_v0 = vld [vmem:[%s88_s3] sm:$0xff] }
  0x12   : > { %118 = vst [vmem:[%s84_s4] sm:$0xff] %v117_v0 }
  0x13 PF: > { %p514_p6 = scmp.ge.s32.totalorder %s628_s13, 1  ;;  %p123_p7 = scmp.lt.s32.totalorder %s628_s13, 3 }
  0x15   : > { %p124_p8 = pnand %p514_p6, %p123_p7 }
  0x17   : > { %127 = sbr.rel (%p124_p8) target bundleno = 336 (0x150), region = 54 }
  0x1c   : > { %s130_s5 = sand.u32 1, %s506_s15   ;;  %s144_s6 = sand.u32 1, %s612_s9   ;;  %v634_v2 = vmov 0.0  }
  0x1d   : > { %s515_s7 = sshll.u32 %s130_s5, 3  ;;  %s703_s8 = sshll.u32 %s144_s6, 1 }
  0x1e   : > { %s153_s16 = sand.u32 7, %s620_s11   ;;  %s132_s17 = scalar_lea.vmem [#allocation0], %s515_s7 }
  0x1f   : > { %v155_v1 = vld [vmem:[%s132_s17] sm:$0xff]  ;;  %s706_s18 = scalar_lea.vmem [#allocation1], %s515_s7  ;;  %s709_s19 = scalar_lea.vmem [#allocation2], %s153_s16 }
  0x20   : > { %156 = vst [vmem:[%s706_s18] sm:$0xff] %v155_v1  ;;  %157 = vst [vmem:[%s709_s19] sm:$0x1] %v634_v2  ;;  %s146_s15 = scalar_lea.vmem [#allocation3], %s703_s8  ;;  %s713_s20 = smov 0  }
  0x21 LB: >> { %v165_v3 = vlaneseq  ;;  %v722_v5 = vstv %s632_s20  ;;  %s192_s9 = scalar_lea.vmem %s706_s18, %s632_s20 [#allocation1]  ;;  %s250_s21 = scalar_lea.vmem [#allocation4], %s632_s20  ;;  %v635_v59 = vmov 1.0   ;;  %s632_s20 = sphi %s713_s20, %s163_s20  }
  0x22   : >> { %s267_s23 = smov [#allocation4] }
  0x23   : >> { %v719_v4 = vshrl.u32 %v165_v3, 7  ;;  %v244_v48 = vand.u32 127, %v165_v3 }
  0x25   : >> { %vm169_vm0 = vcmp.gt.s32.totalorder %v719_v4, %v722_v5  ;;  %vm170_vm1 = vcmp.lt.s32.totalorder %v719_v4, 6  ;;  %v231_v4 = vmov %v719_v4  ;;  %vm740_vm12 = vcmp.eq.s32.totalorder %v244_v48, %v722_v5 }
  0x26   : >> { %vm171_vm2 = vmand %vm169_vm0, %vm170_vm1  ;;  %vm235_vm9 = vcmp.gt.s32.totalorder %v231_v4, %v722_v5  ;;  %vm236_vm10 = vcmp.lt.s32.totalorder %v231_v4, 6  ;;  %v270_v4 = vmov %v719_v4  ;;  %vm296_vm15 = vcmp.gt.s32.totalorder %v244_v48, %v722_v5 }
  0x27   : >> { %v164_v6 = vld [vmem:[%s706_s18] sm:$0xff]  ;;  %v193_v15 = vld [vmem:[%s192_s9] ss:$0 sm:$0xff]  ;;  %s228_s18 = smov %s706_s18  ;;  %vm237_vm11 = vmand %vm235_vm9, %vm236_vm10  ;;  %vm275_vm13 = vcmp.lt.s32.totalorder %v270_v4, 6  ;;  %v287_v4 = vmov %v719_v4 }
  0x28   : >> { %v172_v7 = vsel %vm171_vm2, %v164_v6, 0.0  ;;  %v194_v16 = vand.u32 2147483647, %v193_v15  ;;  %vm219_vm8 = vcmp.lt.f32.partialorder %v193_v15, 0.0  ;;  %v232_v45 = vld [vmem:[%s228_s18] sm:$0xff]  ;;  %s266_s18 = smov %s706_s18  ;;  %vm304_vm14 = vcmp.ge.s32.totalorder %v287_v4, %v722_v5 }
  0x29   : >> { %v173_v8 = vmul.f32 %v172_v7, %v172_v7  ;;  %v238_v49 = vsel %vm237_vm11, %v232_v45, 0.0  ;;  %v263_v60 = vld [vmem:[%s709_s19] ss:$0 sm:$0xff]  ;;  %vm305_vm0 = vmand %vm740_vm12, %vm304_vm14 }
  0x2a   : >> { %v195_v21 = vmax.f32 %v194_v16, 0.0  ;;  %v273_v63 = vld [vmem:[%s266_s18] sm:$0xff]  ;;  %s283_s18 = smov %s266_s18 }
  0x2b   : >> { %v174_v9 = vrot.slane %v173_v8, 4  ;;  %s308_s24 = scalar_lea.vmem %s283_s18, %s632_s20  ;;  %s163_s20 = sadd.s32 1, %s632_s20  }
  0x2c   : >> { %p160_p9 = scmp.ge.s32.totalorder %s163_s20, 3  }
  0x2d   : >> { %v175_v10 = vadd.f32 %v174_v9, %v173_v8  ;;  %s521_s26 = sshll.u32 (%p160_p9), %s620_s11, 3 }
  0x2e   : > { %s335_s29 = scalar_lea.vmem (%p160_p9), %s802_s1, %s521_s26 }
  0x2f   : >> { %v176_v11 = vrot.slane %v175_v10, 2 }
  0x31   : >> { %v177_v12 = vadd.f32 %v176_v11, %v175_v10 }
  0x33   : >> { %v178_v13 = vrot.slane %v177_v12, 1 }
  0x35   : >> { %v179_v14 = vadd.f32 %v178_v13, %v177_v12  ;;  %v294_v13 = vld [vmem:[%s283_s18] sm:$0xff] }
  0x37   : >> { %576 = vrsqrt.f32 %v179_v14  ;;  %vm182_vm3 = vcmp.eq.f32.partialorder %v179_v14, inf  ;;  %v185_v18 = vand.u32 2147483648, %v179_v14  ;;  %vm184_vm4 = vcmp.eq.f32.partialorder %v179_v14, 0.0 }
  0x44   : >> { %v577_v17 = vpop.eup %576 }
  0x45   : >> { %v181_v19 = vmul.f32 %v577_v17, %v179_v14 }
  0x47   : >> { %v183_v20 = vsel %vm182_vm3, %v179_v14, %v181_v19 }
  0x48   : >> { %v186_v22 = vsel %vm184_vm4, %v185_v18, %v183_v20 }
  0x49   : >> { %v196_v23 = vand.u32 2147483647, %v186_v22 }
  0x4b   : >> { %v197_v24 = vmax.f32 %v195_v21, %v196_v23 }
  0x4d   : >> { %578 = vrcp.f32 %v197_v24  ;;  %vm209_vm7 = vcmp.eq.f32.partialorder %v197_v24, 0.0 }
  0x5a   : >> { %v579_v25 = vpop.eup %578 }
  0x5b   : >> { %v199_v26 = vmul.f32 %v579_v25, %v194_v16  ;;  %v202_v27 = vmul.f32 0.0, %v579_v25  ;;  %v206_v28 = vmul.f32 %v579_v25, %v196_v23 }
  0x5d   : >> { %v200_v29 = vmul.f32 %v199_v26, %v199_v26  ;;  %v203_v30 = vmul.f32 %v202_v27, %v202_v27  ;;  %v207_v31 = vmul.f32 %v206_v28, %v206_v28 }
  0x5f   : >> { %v204_v32 = vadd.f32 %v203_v30, %v200_v29 }
  0x61   : >> { %v208_v33 = vadd.f32 %v207_v31, %v204_v32 }
  0x63   : >> { %580 = vrsqrt.f32 %v208_v33  ;;  %vm212_vm5 = vcmp.eq.f32.partialorder %v208_v33, inf  ;;  %v215_v35 = vand.u32 2147483648, %v208_v33  ;;  %vm214_vm6 = vcmp.eq.f32.partialorder %v208_v33, 0.0 }
  0x70   : >> { %v581_v34 = vpop.eup %580 }
  0x71   : >> { %v211_v36 = vmul.f32 %v581_v34, %v208_v33 }
  0x73   : >> { %v213_v37 = vsel %vm212_vm5, %v208_v33, %v211_v36 }
  0x74   : >> { %v216_v38 = vsel %vm214_vm6, %v215_v35, %v213_v37 }
  0x75   : >> { %v217_v39 = vmul.f32 %v216_v38, %v197_v24 }
  0x77   : >> { %v218_v40 = vsel %vm209_vm7, 0.0, %v217_v39 }
  0x78   : >> { %v220_v41 = vxor.u32 2147483648, %v218_v40 }
  0x7a   : >> { %v221_v42 = vsel %vm219_vm8, %v218_v40, %v220_v41 }
  0x7b   : >> { %v732_v43 = vsel %vm184_vm4, %v193_v15, %v221_v42  ;;  %582 = vrcp.f32 %v221_v42  ;;  %v222_v46 = vsub.f32 %v221_v42, %v193_v15 }
  0x7c   : >> { %v227_v44 = vsub.f32 %v193_v15, %v732_v43 }
  0x7e   : >> { %584 = vrcp.f32 %v227_v44 }
  0x88   : >> { %v583_v47 = vpop.eup %582 }
  0x89   : >> { %v224_v50 = vmul.f32 %v583_v47, %v222_v46 }
  0x8b   : >> { %v585_v51 = vpop.eup %584  ;;  %v226_v55 = vsel %vm184_vm4, 0.0, %v224_v50 }
  0x8c   : >> { %v240_v52 = vmul.f32 %v585_v51, %v238_v49  ;;  %v256_v57 = vsel %vm740_vm12, %v226_v55, 0.0 }
  0x8e   : >> { %v241_v54 = vsel %vm184_vm4, 0.0, %v240_v52 }
  0x8f   : >> { %v246_v56 = vsel %vm740_vm12, %v241_v54, 0.0 }
  0x90   : >> { %247 = vadd.xlane.f32.xlu0 %v246_v56 }
  0x94   : >> { %257 = vadd.xlane.f32.xlu0 %v256_v57 }
 0x119   : >> { %v248_v58 = vpop.xlane.xlu0 %247 }
 0x11a   : >> { %249 = vst [vmem:[#allocation4] sm:$0xff] %v248_v58 }
 0x11b   : >> { %251 = vst [vmem:[%s250_s21] sm:$0x1] %v635_v59 }
 0x11d   : >> { %v258_v61 = vpop.xlane.xlu0 %257 }
 0x11e   : >> { %v264_v62 = vsel %vm740_vm12, %v258_v61, %v263_v60 }
 0x11f   : >> { %265 = vst [vmem:[%s709_s19] sm:$0x1] %v264_v62 }
 0x122   : >> { %v272_v0 = vld [vmem:[%s267_s23] sm:$0xff]  ;;  %s284_s23 = smov %s267_s23 }
 0x123   : >> { %v274_v1 = vmul.f32 %v273_v63, %v272_v0  ;;  %v292_v12 = vld [vmem:[%s284_s23] sm:$0xff] }
 0x125   : >> { %v276_v2 = vsel %vm275_vm13, %v274_v1, 0.0 }
 0x126   : >> { %v277_v3 = vrot.slane %v276_v2, 4  ;;  %v320_v4 = vld [vmem:[#allocation2] sm:$0x3] (%p160_p9) }
 0x127   : > { %323 = vst [vmem:[%s146_s15] sm:$0x3] (%p160_p9), %v320_v4 }
 0x128   : >> { %v278_v6 = vadd.f32 %v277_v3, %v276_v2 }
 0x12a   : >> { %v279_v7 = vrot.slane %v278_v6, 2 }
 0x12c   : >> { %v280_v8 = vadd.f32 %v279_v7, %v278_v6 }
 0x12e   : >> { %v281_v9 = vrot.slane %v280_v8, 1 }
 0x130   : >> { %v282_v10 = vadd.f32 %v281_v9, %v280_v8 }
 0x132   : >> { %v288_v11 = vmul.f32 %v282_v10, %v258_v61 }
 0x134   : >> { %v293_v14 = vmul.f32 %v292_v12, %v288_v11 }
 0x136   : >> { %v297_v15 = vsub.f32 %v294_v13, %v293_v14 }
 0x138   : >> { %v298_v16 = vsel %vm296_vm15, %v297_v15, %v294_v13 }
 0x139   : >> { %v306_v17 = vsel %vm305_vm0, %v292_v12, %v298_v16 }
 0x13a   : >> { %307 = vst [vmem:[%s283_s18] sm:$0xff] %v306_v17 }
 0x13f   : > { %162 = sbr.rel (!%p160_p9) target bundleno = 33 (0x21), region = 175 }
 0x141   : >> { %v309_v18 = vld [vmem:[%s308_s24] ss:$0 sm:$0xff] }
 0x142   : >> { %v314_v19 = vsel %vm740_vm12, %v732_v43, %v309_v18 }
 0x143   : >> { %315 = vst [vmem:[%s308_s24] sm:$0x1] %v314_v19 }
 0x144   : > { %p372_p10 = scmp.lt.s32.totalorder (%p686_p3), %s620_s11, 0  ;;  %s373_s30 = ssub.s32 (%p686_p3), 0, %s620_s11  ;;  %v396_v20 = vld [vmem:[%s146_s15] sm:$0x3] (%p686_p3) }
 0x145   : > { %s522_s3 = smin.u32 (%p686_p3), %s620_s11, %s373_s30 }
 0x146   : > { %s375_s4 = sshrl.u32 (%p686_p3), %s522_s3, 3 }
 0x147   : > { %371 = sbr.rel (!%p686_p3) target bundleno = 336 (0x150), region = 99  ;;  %s376_s5 = ssub.s32 (%p686_p3), 0, %s375_s4 }
 0x14a   : > { %v364_v5 = vld [vmem:[%s706_s18] sm:$0xff] }
 0x14b   : > { %365 = vst [vmem:[%s335_s29] sm:$0xff] %v364_v5 }
 0x14c   : > { %s814_s5 = smov (!%p372_p10, %s376_s5), %s375_s4 }
 0x14d   : > { %s523_s6 = sshll.u32 %s814_s5, 1 }
 0x14e   : > { %s379_s17 = scalar_lea.vmem %s803_s2, %s523_s6 }
 0x14f   : > { %397 = vst [vmem:[%s379_s17] sm:$0x3] %v396_v20 }
 0x150 PF: > { %s9_s13 = sadd.s32 1, %s628_s13   ;;  %s807_s9 = smov %s616_s10 }
 0x151   : > { %p6_p11 = scmp.ge.s32.totalorder %s9_s13, 4   ;;  %s808_s10 = smov %s692_s25 }
 0x152   : > { %s809_s11 = smov %s624_s12  ;;  %s810_s12 = smov %s812_s14 }
 0x153   :  { %8 = sbr.rel (!%p6_p11) target bundleno = 3 (0x3), region = 186 }

// kernel: custom-call.48
= control target key start
LH: loop header
LB: loop body
LE: loop exit
PB: predicated region body
PF: predicated region fallthrough
CT: control target
= control target key end

     0   :  { %s243_s6 = smov 0   ;;  %s270_s0 = inlined_call_operand.vmem [shape: f32[2,3,3], index: 0, kind: input, shape index: {}]   ;;  %s271_s1 = inlined_call_operand.vmem [shape: f32[2,3,3], index: 1, kind: output, shape index: {}]  }
   0x1 LB: > { %s205_s7 = sadd.s32 4294967295, %s231_s6   ;;  %p207_p0 = scmp.ge.s32.totalorder %s231_s6, 2  ;;  %s231_s6 = sphi %s243_s6, %s7_s6  }
   0x2   : > { %s23_s8 = sand.u32 (!%p207_p0), 1, %s231_s6   ;;  %s209_s9 = sshll.u32 (!%p207_p0), %s231_s6, 2 }
   0x3   : > { %21 = sbr.rel (%p207_p0) target bundleno = 10 (0xa), region = 16  ;;  %s208_s10 = sshll.u32 (!%p207_p0), %s23_s8, 2 }
   0x4   : > { %s27_s13 = scalar_lea.vmem (!%p207_p0), %s270_s0, %s209_s9  ;;  %s25_s14 = scalar_lea.vmem (!%p207_p0), [#allocation1], %s208_s10 }
   0x8   : > { %v44_v0 = vld [vmem:[%s27_s13] sm:$0xf] }
   0x9   : > { %45 = vst [vmem:[%s25_s14] sm:$0xf] %v44_v0 }
   0xa PF: > { %p210_p1 = scmp.ge.s32.totalorder %s231_s6, 1  ;;  %p62_p2 = scmp.lt.s32.totalorder %s231_s6, 3 }
   0xc   : > { %p63_p3 = pnand %p210_p1, %p62_p2 }
   0xd   : > { %s259_s15 = sand.u32 (!%p63_p3), 1, %s205_s7   ;;  %s214_s19 = sshll.u32 (!%p63_p3), %s205_s7, 2 }
   0xe   : > { %66 = sbr.rel (%p63_p3) target bundleno = 329 (0x149), region = 50  ;;  %s211_s16 = sshll.u32 (!%p63_p3), %s259_s15, 2 }
   0xf   : > { %s75_s17 = scalar_lea.vmem (!%p63_p3), [#allocation1], %s211_s16  ;;  %s79_s18 = scalar_lea.vmem (!%p63_p3), [#allocation3], %s211_s16 }
  0x10   : > { %s133_s22 = scalar_lea.vmem (!%p63_p3), %s271_s1, %s214_s19 }
  0x13   : > { %v85_v1 = vlaneseq  ;;  %v83_v2 = vld [vmem:[%s75_s17] sm:$0xf]  ;;  %vm99_vm1 = vcmask 23552  }
  0x14   : > { %84 = vst [vmem:[#allocation0] sm:$0xf] %v83_v2 }
  0x15   : > { %v86_v3 = vand.u32 127, %v85_v1  ;;  %v88_v4 = vshrl.u32 %v85_v1, 7 }
  0x17   : > { %vm94_vm0 = vcmp.eq.s32.totalorder %v86_v3, 0  ;;  %vm90_vm2 = vcmp.eq.s32.totalorder %v86_v3, %v88_v4  ;;  %vm103_vm3 = vcmp.eq.s32.totalorder %v86_v3, 1  ;;  %vm114_vm4 = vcmp.eq.s32.totalorder %v86_v3, 2 }
  0x1b   : > { %v91_v5 = vld [vmem:[#allocation0] sm:$0xff] }
  0x1c   : > { %v98_v6 = vld [vmem:[#allocation0 + $0x1] ss:$0 sm:$0xff]  ;;  %v95_v7 = vsel %vm94_vm0, %v91_v5, 1.0  ;;  %v109_v11 = vld [vmem:[#allocation0 + $0x2] ss:$0 sm:$0xff] }
  0x1d   : > { %v100_v8 = vsel %vm99_vm1, %v98_v6, 0.0  ;;  %v96_v9 = vsel %vm90_vm2, %v95_v7, 0.0  ;;  %v111_v12 = vsel %vm99_vm1, %v109_v11, 0.0 }
  0x1e   : > { %v104_v10 = vmul.f32 %v100_v8, %v96_v9 }
  0x20   : > { %105 = vadd.xlane.f32.xlu0 %v104_v10 }
  0xa9   : > { %v106_v13 = vpop.xlane.xlu0 %105 }
  0xaa   : > { %v107_v14 = vsel %vm103_vm3, %v106_v13, %v96_v9 }
  0xab   : > { %v115_v15 = vmul.f32 %v111_v12, %v107_v14 }
  0xad   : > { %116 = vadd.xlane.f32.xlu0 %v115_v15 }
 0x136   : > { %v117_v16 = vpop.xlane.xlu0 %116 }
 0x137   : > { %v118_v17 = vsel %vm114_vm4, %v117_v16, %v107_v14 }
 0x138   : > { %119 = vst [vmem:[#allocation2] sm:$0xff] %v118_v17 }
 0x13f   : > { %v124_v18 = vld [vmem:[#allocation2] sm:$0xf] }
 0x140   : > { %127 = vst [vmem:[%s79_s18] sm:$0xf] %v124_v18 }
 0x147   : > { %v150_v19 = vld [vmem:[%s79_s18] sm:$0xf] }
 0x148   : > { %151 = vst [vmem:[%s133_s22] sm:$0xf] %v150_v19 }
 0x149 PF: > { %s7_s6 = sadd.s32 1, %s231_s6  }
 0x14a   : > { %p4_p4 = scmp.ge.s32.totalorder %s7_s6, 4  }
 0x14c   :  { %6 = sbr.rel (!%p4_p4) target bundleno = 1 (0x1), region = 112 }

// kernel: _kabsch_rmsds_bucket.1
= control target key start
LH: loop header
LB: loop body
LE: loop exit
PB: predicated region body
PF: predicated region fallthrough
CT: control target
= control target key end

     0   :  { %7 = vsyncpa [#allocation3], 0  ;;  %s216_s0 = inlined_call_operand.hbm [shape: f32[3,8,128], index: 0, kind: input, shape index: {}]   ;;  %s217_s1 = inlined_call_operand.hbm [shape: f32[3,8,128], index: 1, kind: input, shape index: {}]   ;;  %s218_s2 = inlined_call_operand.vmem [shape: f32[8,128], index: 2, kind: output, shape index: {}]  }
   0x1   :  { %8 = vsyncpa [#allocation5], 0  ;;  %s188_s9 = smov [#allocation2]  }
   0x2   :  { %s14_s10 = sshll.u32 %s188_s9, 4  ;;  %s15_s10 = int_to_ptr.vmem [resolvable:$true] %s14_s10 }
   0x3   :  { %s152_s11 = scalar_lea.vmem %s15_s10, 384  ;;  %p157_p1 = scmp.lt.s32.totalorder %s15_s10, %s15_s10 }
   0x4   :  { %p153_p0 = scmp.ne.s32.totalorder %s15_s10, %s152_s11  ;;  %p158_p2 = scmp.lt.s32.totalorder %s152_s11, %s152_s11 }
   0x6   :  { %p159_p3 = por %p158_p2, %p157_p1 }
   0x8   :  { %p160_p4 = pnand %p159_p3, %p153_p0 }
   0xa   :  { %163 = shalt.err (!%p160_p4)
}
   0xb   :  { %s189_s12 = smov 128   ;;  %s190_s13 = smov 8  }
   0xc   :  { %20 = dma.hbm_to_vmem [thread:$0]  %s216_s0, 384, %s15_s10, [#allocation3], %s189_s12, %s189_s12, %s190_s13  }
   0xd   :  { %s191_s16 = smov [#allocation4]  }
   0xe   :  { %s26_s17 = sshll.u32 %s191_s16, 4  ;;  %s27_s17 = int_to_ptr.vmem [resolvable:$true] %s26_s17 }
   0xf   :  { %s172_s18 = scalar_lea.vmem %s27_s17, 384  ;;  %p177_p6 = scmp.lt.s32.totalorder %s27_s17, %s27_s17 }
  0x10   :  { %p173_p5 = scmp.ne.s32.totalorder %s27_s17, %s172_s18  ;;  %p178_p7 = scmp.lt.s32.totalorder %s172_s18, %s172_s18 }
  0x12   :  { %p179_p8 = por %p178_p7, %p177_p6 }
  0x14   :  { %p180_p9 = pnand %p179_p8, %p173_p5 }
  0x16   :  { %183 = shalt.err (!%p180_p9)
}
  0x17   :  { %32 = dma.hbm_to_vmem [thread:$0]  %s217_s1, 384, %s27_s17, [#allocation5], %s189_s12, %s189_s12, %s190_s13  }
  0x18   :  { %184 = dma.done.wait [#allocation3], 384  }
  0x19   :  { %185 = vsyncadd [#allocation3], 4294966912 }
  0x1a   :  { %186 = dma.done.wait [#allocation5], 384  }
  0x1b   :  { %187 = vsyncadd [#allocation5], 4294966912  ;;  %v39_v0 = vld [vmem:[#allocation2] sm:$0xff]  ;;  %v43_v1 = vld [vmem:[#allocation2 + $0x10] sm:$0xff]  ;;  %vm101_vm0 = vcmask 7168   ;;  %vm103_vm1 = vcmask 15360  }
  0x1c   :  { %49 = vadd.xlane.f32.xlu0 %v39_v0  ;;  %53 = vadd.xlane.f32.xlu1 %v43_v1  ;;  %v41_v2 = vld [vmem:[#allocation2 + $0x8] sm:$0xff]  ;;  %v44_v3 = vld [vmem:[#allocation4] sm:$0xff]  ;;  %v88_v4 = vmul.f32 %v39_v0, %v39_v0  ;;  %v46_v6 = vld [vmem:[#allocation4 + $0x8] sm:$0xff]  ;;  %v91_v8 = vmul.f32 %v43_v1, %v43_v1  ;;  %vm105_vm2 = vcmask 23552   ;;  %vm107_vm3 = vcmask 31744  }
  0x1d   :  { %v89_v5 = vmul.f32 %v41_v2, %v41_v2  ;;  %v48_v7 = vld [vmem:[#allocation4 + $0x10] sm:$0xff]  ;;  %v61_v9 = vmul.f32 %v44_v3, %v39_v0  ;;  %v64_v10 = vmul.f32 %v46_v6, %v39_v0  ;;  %v70_v13 = vmul.f32 %v44_v3, %v41_v2 }
  0x1e   :  { %v67_v12 = vmul.f32 %v48_v7, %v39_v0  ;;  %v93_v15 = vmul.f32 %v44_v3, %v44_v3  ;;  %v73_v16 = vmul.f32 %v46_v6, %v41_v2  ;;  %v76_v17 = vmul.f32 %v48_v7, %v41_v2 }
  0x1f   :  { %v90_v11 = vadd.f32 %v89_v5, %v88_v4  ;;  %v95_v19 = vmul.f32 %v46_v6, %v46_v6  ;;  %v79_v20 = vmul.f32 %v44_v3, %v43_v1  ;;  %v82_v21 = vmul.f32 %v46_v6, %v43_v1 }
  0x20   :  { %51 = vadd.xlane.f32.xlu0 %v41_v2  ;;  %55 = vadd.xlane.f32.xlu1 %v44_v3  ;;  %v97_v23 = vmul.f32 %v48_v7, %v48_v7  ;;  %v85_v24 = vmul.f32 %v48_v7, %v43_v1  ;;  %vm109_vm4 = vcmask 39936   ;;  %vm111_vm5 = vcmask 48128  }
  0x21   :  { %v92_v14 = vadd.f32 %v91_v8, %v90_v11  ;;  %vm113_vm6 = vcmask 56320   ;;  %vm115_vm7 = vcmask 64512   ;;  %vm117_vm8 = vcmask 72704  }
  0x22   :  { %vm119_vm9 = vcmask 80896   ;;  %vm121_vm10 = vcmask 89088   ;;  %vm123_vm11 = vcmask 97280   ;;  %vm125_vm12 = vcmask 105472  }
  0x23   :  { %v94_v18 = vadd.f32 %v93_v15, %v92_v14  ;;  %vm127_vm13 = vcmask 113664   ;;  %vm129_vm14 = vcmask 121856   ;;  %vm131_vm15 = vcmask 130048  }
  0x24   :  { %57 = vadd.xlane.f32.xlu0 %v46_v6  ;;  %59 = vadd.xlane.f32.xlu1 %v48_v7 }
  0x25   :  { %v96_v22 = vadd.f32 %v95_v19, %v94_v18 }
  0x27   :  { %v98_v25 = vadd.f32 %v97_v23, %v96_v22 }
  0x28   :  { %62 = vadd.xlane.f32.xlu0 %v61_v9  ;;  %65 = vadd.xlane.f32.xlu1 %v64_v10 }
  0x2c   :  { %68 = vadd.xlane.f32.xlu0 %v67_v12  ;;  %71 = vadd.xlane.f32.xlu1 %v70_v13 }
  0x30   :  { %74 = vadd.xlane.f32.xlu0 %v73_v16  ;;  %77 = vadd.xlane.f32.xlu1 %v76_v17 }
  0x34   :  { %80 = vadd.xlane.f32.xlu0 %v79_v20  ;;  %83 = vadd.xlane.f32.xlu1 %v82_v21 }
  0x38   :  { %86 = vadd.xlane.f32.xlu0 %v85_v24  ;;  %99 = vadd.xlane.f32.xlu1 %v98_v25 }
  0xa5   :  { %v50_v26 = vpop.xlane.xlu0 %49  ;;  %v54_v27 = vpop.xlane.xlu1 %53 }
  0xa9   :  { %v52_v28 = vpop.xlane.xlu0 %51  ;;  %v56_v29 = vpop.xlane.xlu1 %55 }
  0xaa   :  { %v102_v30 = vsel %vm101_vm0, %v50_v26, %v52_v28 }
  0xab   :  { %v104_v31 = vsel %vm103_vm1, %v102_v30, %v54_v27 }
  0xac   :  { %v106_v32 = vsel %vm105_vm2, %v104_v31, %v56_v29 }
  0xad   :  { %v58_v33 = vpop.xlane.xlu0 %57  ;;  %v60_v34 = vpop.xlane.xlu1 %59 }
  0xae   :  { %v108_v35 = vsel %vm107_vm3, %v106_v32, %v58_v33 }
  0xaf   :  { %v110_v36 = vsel %vm109_vm4, %v108_v35, %v60_v34 }
  0xb1   :  { %v63_v37 = vpop.xlane.xlu0 %62  ;;  %v66_v38 = vpop.xlane.xlu1 %65 }
  0xb2   :  { %v112_v39 = vsel %vm111_vm5, %v110_v36, %v63_v37 }
  0xb3   :  { %v114_v40 = vsel %vm113_vm6, %v112_v39, %v66_v38 }
  0xb5   :  { %v69_v41 = vpop.xlane.xlu0 %68  ;;  %v72_v42 = vpop.xlane.xlu1 %71 }
  0xb6   :  { %v116_v43 = vsel %vm115_vm7, %v114_v40, %v69_v41 }
  0xb7   :  { %v118_v44 = vsel %vm117_vm8, %v116_v43, %v72_v42 }
  0xb9   :  { %v75_v45 = vpop.xlane.xlu0 %74  ;;  %v78_v46 = vpop.xlane.xlu1 %77 }
  0xba   :  { %v120_v47 = vsel %vm119_vm9, %v118_v44, %v75_v45 }
  0xbb   :  { %v122_v48 = vsel %vm121_vm10, %v120_v47, %v78_v46 }
  0xbd   :  { %v81_v49 = vpop.xlane.xlu0 %80  ;;  %v84_v50 = vpop.xlane.xlu1 %83 }
  0xbe   :  { %v124_v51 = vsel %vm123_vm11, %v122_v48, %v81_v49 }
  0xbf   :  { %v126_v52 = vsel %vm125_vm12, %v124_v51, %v84_v50 }
  0xc1   :  { %v87_v53 = vpop.xlane.xlu0 %86  ;;  %v100_v54 = vpop.xlane.xlu1 %99 }
  0xc2   :  { %v128_v55 = vsel %vm127_vm13, %v126_v52, %v87_v53 }
  0xc3   :  { %v130_v56 = vsel %vm129_vm14, %v128_v55, %v100_v54 }
  0xc4   :  { %v132_v57 = vsel %vm131_vm15, %v130_v56, 0.0 }
  0xc5   :  { %133 = vst [vmem:[%s218_s2] sm:$0xff] %v132_v57 }
  0xc6   :  { %138 = vsyncpa [#allocation3], 1 }
  0xc7   :  { %139 = vsyncpa [#allocation5], 1 }

// kernel: custom-call.40
= control target key start
LH: loop header
LB: loop body
LE: loop exit
PB: predicated region body
PF: predicated region fallthrough
CT: control target
= control target key end

     0   :  { %s6_s0 = inlined_call_operand.hbm [shape: pred[2], index: 0, kind: output, shape index: {}]  }

// kernel: custom-call.45
= control target key start
LH: loop header
LB: loop body
LE: loop exit
PB: predicated region body
PF: predicated region fallthrough
CT: control target
= control target key end

     0   :  { %s350_s6 = smov 0   ;;  %s352_s7 = smov 0   ;;  %s397_s0 = inlined_call_operand.vmem [shape: f32[2,3,3], index: 0, kind: input, shape index: {}]   ;;  %s398_s1 = inlined_call_operand.vmem [shape: f32[2,3,3], index: 1, kind: output, shape index: {}]  }
   0x1   :  { %s354_s8 = smov 0  }
   0x2 LB: > { %s272_s9 = sadd.s32 4294967295, %s337_s8   ;;  %s26_s10 = sadd.s32 1, %s333_s7  ;;  %s337_s8 = sphi %s354_s8, %s7_s8   ;;  %s333_s7 = sphi %s352_s7, %s400_s7   ;;  %s329_s6 = sphi %s350_s6, %s399_s6  }
   0x3   : > { %p28_p0 = scmp.ge.s32.totalorder %s26_s10, 2  ;;  %p274_p1 = scmp.ge.s32.totalorder %s337_s8, 2 }
   0x4   : > { %s42_s11 = sand.u32 (!%p274_p1), 1, %s337_s8   ;;  %s276_s12 = sshll.u32 (!%p274_p1), %s333_s7, 2 }
   0x5   : > { %s402_s10 = smov (%p28_p0, %s26_s10), 0  ;;  %40 = sbr.rel (%p274_p1) target bundleno = 12 (0xc), region = 16 }
   0x6   : > { %s275_s13 = sshll.u32 (!%p274_p1), %s42_s11, 2  ;;  %s48_s16 = scalar_lea.vmem (!%p274_p1), %s397_s0, %s276_s12 }
   0x7   : > { %s44_s17 = scalar_lea.vmem (!%p274_p1), [#allocation1], %s275_s13 }
   0xa   : > { %v65_v0 = vld [vmem:[%s48_s16] sm:$0xf] }
   0xb   : > { %66 = vst [vmem:[%s44_s17] sm:$0xf] %v65_v0 }
   0xc PF: > { %p277_p2 = scmp.ge.s32.totalorder %s337_s8, 1  ;;  %p83_p3 = scmp.lt.s32.totalorder %s337_s8, 3 }
   0xe   : > { %p84_p4 = pnand %p277_p2, %p83_p3 }
   0xf   : > { %s377_s18 = sand.u32 (!%p84_p4), 1, %s272_s9   ;;  %s281_s22 = sshll.u32 (!%p84_p4), %s329_s6, 2 }
  0x10   : > { %87 = sbr.rel (%p84_p4) target bundleno = 544 (0x220), region = 50  ;;  %s278_s19 = sshll.u32 (!%p84_p4), %s377_s18, 2 }
  0x11   : > { %s96_s20 = scalar_lea.vmem (!%p84_p4), [#allocation1], %s278_s19  ;;  %s100_s21 = scalar_lea.vmem (!%p84_p4), [#allocation3], %s278_s19 }
  0x12   : > { %s184_s25 = scalar_lea.vmem (!%p84_p4), %s398_s1, %s281_s22 }
  0x15   : > { %v339_v1 = vmov 0.0   ;;  %v104_v5 = vld [vmem:[%s96_s20] sm:$0xf]  ;;  %vm107_vm0 = vcmask 7168   ;;  %vm125_vm1 = vcmask 15368   ;;  %vm142_vm2 = vcmask 1047553  }
  0x16   : > { %106 = vst [vmem:[#allocation2] sm:$0xff] %v339_v1  ;;  %105 = vst [vmem:[#allocation0] sm:$0xf] %v104_v5  ;;  %vm147_vm4 = vcmask 23568   ;;  %vm164_vm5 = vcmask 1047554  }
  0x17   : > { %vm143_vm3 = vmand %vm125_vm1, %vm142_vm2 }
  0x18   : > { %vm165_vm6 = vmand %vm147_vm4, %vm164_vm5 }
  0x1d   : > { %v108_v2 = vld [vmem:[#allocation2] ss:$0 sm:$0xff]  ;;  %v109_v6 = vld [vmem:[#allocation0] ss:$0 sm:$0xff]  ;;  %v129_v18 = vld [vmem:[#allocation0 + $0x1] ss:$0 sm:$0xff] }
  0x1e   : > { %v110_v3 = vmul.f32 %v108_v2, %v108_v2  ;;  %v117_v4 = vmul.f32 0.0, %v108_v2  ;;  %v115_v10 = vld [vmem:[#allocation0] sm:$0xff] }
  0x1f   : > { %v151_v30 = vld [vmem:[#allocation0 + $0x2] ss:$0 sm:$0xff] }
  0x20   : > { %111 = vadd.xlane.f32.xlu0 %v110_v3 }
  0x24   : > { %118 = vadd.xlane.f32.xlu0 %v117_v4 }
  0xa9   : > { %v112_v7 = vpop.xlane.xlu0 %111 }
  0xaa   : > { %v113_v8 = vsub.f32 %v109_v6, %v112_v7 }
  0xac   : > { %309 = vrsqrt.f32 %v113_v8 }
  0xad   : > { %v119_v9 = vpop.xlane.xlu0 %118 }
  0xae   : > { %v120_v11 = vsub.f32 %v115_v10, %v119_v9 }
  0xb9   : > { %v310_v12 = vpop.eup %309 }
  0xba   : > { %v121_v13 = vmul.f32 %v310_v12, %v120_v11 }
  0xbc   : > { %v122_v14 = vsel %vm107_vm0, %v121_v13, 0.0 }
  0xbd   : > { %124 = vst [vmem:[#allocation2] sm:$0xff] %v122_v14 }
  0xc4   : > { %v127_v15 = vld [vmem:[#allocation2 + $0x1] ss:$0 sm:$0xff] }
  0xc5   : > { %v130_v16 = vmul.f32 %v127_v15, %v127_v15  ;;  %v137_v17 = vmul.f32 %v127_v15, %v122_v14 }
  0xc7   : > { %131 = vadd.xlane.f32.xlu1 %v130_v16 }
  0xcb   : > { %138 = vadd.xlane.f32.xlu1 %v137_v17 }
 0x150   : > { %v132_v19 = vpop.xlane.xlu1 %131 }
 0x151   : > { %v133_v20 = vsub.f32 %v129_v18, %v132_v19 }
 0x153   : > { %311 = vrsqrt.f32 %v133_v20 }
 0x154   : > { %v139_v21 = vpop.xlane.xlu1 %138 }
 0x155   : > { %v140_v22 = vsub.f32 %v115_v10, %v139_v21 }
 0x160   : > { %v312_v23 = vpop.eup %311 }
 0x161   : > { %v141_v24 = vmul.f32 %v312_v23, %v140_v22 }
 0x163   : > { %v144_v25 = vsel %vm143_vm3, %v141_v24, 0.0 }
 0x164   : > { %v145_v26 = vadd.f32 %v144_v25, %v122_v14 }
 0x166   : > { %146 = vst [vmem:[#allocation2] sm:$0xff] %v145_v26 }
 0x16d   : > { %v149_v27 = vld [vmem:[#allocation2 + $0x2] ss:$0 sm:$0xff] }
 0x16e   : > { %v159_v28 = vmul.f32 %v149_v27, %v145_v26  ;;  %v152_v29 = vmul.f32 %v149_v27, %v149_v27 }
 0x170   : > { %160 = vadd.xlane.f32.xlu1 %v159_v28  ;;  %153 = vadd.xlane.f32.xlu0 %v152_v29 }
 0x1f9   : > { %v154_v31 = vpop.xlane.xlu0 %153  ;;  %v161_v33 = vpop.xlane.xlu1 %160 }
 0x1fa   : > { %v155_v32 = vsub.f32 %v151_v30, %v154_v31  ;;  %v162_v34 = vsub.f32 %v115_v10, %v161_v33 }
 0x1fc   : > { %313 = vrsqrt.f32 %v155_v32 }
 0x209   : > { %v314_v35 = vpop.eup %313 }
 0x20a   : > { %v163_v36 = vmul.f32 %v314_v35, %v162_v34 }
 0x20c   : > { %v166_v37 = vsel %vm165_vm6, %v163_v36, 0.0 }
 0x20d   : > { %v167_v38 = vadd.f32 %v166_v37, %v145_v26 }
 0x20f   : > { %168 = vst [vmem:[#allocation2] sm:$0xff] %v167_v38 }
 0x216   : > { %v173_v39 = vld [vmem:[#allocation2] sm:$0xf] }
 0x217   : > { %176 = vst [vmem:[%s100_s21] sm:$0xf] %v173_v39 }
 0x21e   : > { %v201_v40 = vld [vmem:[%s100_s21] sm:$0xf] }
 0x21f   : > { %202 = vst [vmem:[%s184_s25] sm:$0xf] %v201_v40 }
 0x220 PF: > { %s7_s8 = sadd.s32 1, %s337_s8   ;;  %s399_s6 = smov %s333_s7 }
 0x221   : > { %p4_p5 = scmp.ge.s32.totalorder %s7_s8, 4   ;;  %s400_s7 = smov %s402_s10 }
 0x223   :  { %6 = sbr.rel (!%p4_p5) target bundleno = 2 (0x2), region = 114 }

// kernel: custom-call.46
= control target key start
LH: loop header
LB: loop body
LE: loop exit
PB: predicated region body
PF: predicated region fallthrough
CT: control target
= control target key end

     0   :  { %s350_s6 = smov 0   ;;  %s352_s7 = smov 0   ;;  %s397_s0 = inlined_call_operand.vmem [shape: f32[2,1,3,3], index: 0, kind: input, shape index: {}]   ;;  %s398_s1 = inlined_call_operand.vmem [shape: f32[2,1,3,3], index: 1, kind: output, shape index: {}]  }
   0x1   :  { %s354_s8 = smov 0  }
   0x2 LB: > { %s276_s9 = sadd.s32 4294967295, %s337_s8   ;;  %s33_s10 = sadd.s32 1, %s333_s7  ;;  %s337_s8 = sphi %s354_s8, %s7_s8   ;;  %s333_s7 = sphi %s352_s7, %s400_s7   ;;  %s329_s6 = sphi %s350_s6, %s399_s6  }
   0x3   : > { %p35_p0 = scmp.ge.s32.totalorder %s33_s10, 2  ;;  %p278_p1 = scmp.ge.s32.totalorder %s337_s8, 2 }
   0x4   : > { %s49_s11 = sand.u32 (!%p278_p1), 1, %s337_s8   ;;  %s280_s12 = sshll.u32 (!%p278_p1), %s333_s7, 2 }
   0x5   : > { %s402_s10 = smov (%p35_p0, %s33_s10), 0  ;;  %47 = sbr.rel (%p278_p1) target bundleno = 12 (0xc), region = 16 }
   0x6   : > { %s279_s13 = sshll.u32 (!%p278_p1), %s49_s11, 2  ;;  %s56_s16 = scalar_lea.vmem (!%p278_p1), %s397_s0, %s280_s12 }
   0x7   : > { %s51_s17 = scalar_lea.vmem (!%p278_p1), [#allocation1], %s279_s13 }
   0xa   : > { %v73_v0 = vld [vmem:[%s56_s16] sm:$0xf] }
   0xb   : > { %74 = vst [vmem:[%s51_s17] sm:$0xf] %v73_v0 }
   0xc PF: > { %p281_p2 = scmp.ge.s32.totalorder %s337_s8, 1  ;;  %p91_p3 = scmp.lt.s32.totalorder %s337_s8, 3 }
   0xe   : > { %p92_p4 = pnand %p281_p2, %p91_p3 }
  0x10   : > { %95 = sbr.rel (%p92_p4) target bundleno = 500 (0x1f4), region = 50 }
  0x15   : > { %s377_s18 = sand.u32 1, %s276_s9   ;;  %v114_v1 = vlaneseq  ;;  %v339_v11 = vmov -1.0   ;;  %s285_s22 = sshll.u32 %s329_s6, 2 }
  0x16   : > { %s282_s19 = sshll.u32 %s377_s18, 2  ;;  %s183_s25 = scalar_lea.vmem %s398_s1, %s285_s22 }
  0x17   : > { %s104_s20 = scalar_lea.vmem [#allocation1], %s282_s19  ;;  %v115_v3 = vand.u32 127, %v114_v1  ;;  %v118_v4 = vshrl.u32 %v114_v1, 7  ;;  %s108_s21 = scalar_lea.vmem [#allocation3], %s282_s19 }
  0x18   : > { %v112_v2 = vld [vmem:[%s104_s20] sm:$0xf] }
  0x19   : > { %113 = vst [vmem:[#allocation0] sm:$0xf] %v112_v2  ;;  %vm116_vm0 = vcmp.lt.s32.totalorder %v115_v3, 3  ;;  %vm125_vm1 = vcmp.ge.s32.totalorder %v118_v4, %v115_v3  ;;  %vm120_vm2 = vcmp.eq.s32.totalorder %v118_v4, %v115_v3  ;;  %vm139_vm4 = vcmp.eq.s32.totalorder %v115_v3, 0 }
  0x1a   : > { %vm126_vm3 = vmand %vm125_vm1, %vm116_vm0  ;;  %vm136_vm5 = vcmp.eq.s32.totalorder %v115_v3, %v118_v4  ;;  %v140_v12 = vsel %vm139_vm4, 1.0, %v339_v11  ;;  %vm147_vm6 = vcmp.eq.s32.totalorder %v115_v3, 1  ;;  %vm157_vm7 = vcmp.eq.s32.totalorder %v115_v3, 2 }
  0x1b   : > { %v141_v13 = vsel %vm136_vm5, %v140_v12, 0.0 }
  0x20   : > { %v121_v5 = vld [vmem:[#allocation0] sm:$0xff] }
  0x21   : > { %v122_v6 = vsel %vm120_vm2, %v121_v5, 0.0  ;;  %v127_v7 = vsel %vm126_vm3, %v121_v5, 0.0 }
  0x22   : > { %123 = vadd.xlane.f32.xlu0 %v122_v6 }
  0xab   : > { %v124_v8 = vpop.xlane.xlu0 %123 }
  0xac   : > { %313 = vrcp.f32 %v124_v8  ;;  %vm164_vm8 = vweird.f32 %v124_v8 }
  0xb9   : > { %v314_v9 = vpop.eup %313 }
  0xba   : > { %v129_v10 = vmul.f32 %v314_v9, %v127_v7 }
  0xbc   : > { %130 = vst [vmem:[#allocation4] sm:$0xff] %v129_v10 }
  0xc3   : > { %v143_v14 = vld [vmem:[#allocation4 + $0x1] ss:$0 sm:$0xff]  ;;  %v153_v17 = vld [vmem:[#allocation4 + $0x2] ss:$0 sm:$0xff] }
  0xc4   : > { %v144_v15 = vxor.u32 2147483648, %v143_v14  ;;  %v154_v19 = vxor.u32 2147483648, %v153_v17 }
  0xc6   : > { %v148_v16 = vmul.f32 %v144_v15, %v141_v13 }
  0xc8   : > { %149 = vadd.xlane.f32.xlu0 %v148_v16 }
 0x151   : > { %v150_v18 = vpop.xlane.xlu0 %149 }
 0x152   : > { %v151_v20 = vsel %vm147_vm6, %v150_v18, %v141_v13 }
 0x153   : > { %v158_v21 = vmul.f32 %v154_v19, %v151_v20 }
 0x155   : > { %159 = vadd.xlane.f32.xlu1 %v158_v21 }
 0x1de   : > { %v160_v22 = vpop.xlane.xlu1 %159 }
 0x1df   : > { %v161_v23 = vsel %vm157_vm7, %v160_v22, %v151_v20 }
 0x1e0   : > { %v163_v24 = vmul.f32 %v314_v9, %v161_v23 }
 0x1e2   : > { %v165_v25 = vsel %vm164_vm8, %v161_v23, %v163_v24 }
 0x1e3   : > { %166 = vst [vmem:[#allocation2] sm:$0xff] %v165_v25 }
 0x1ea   : > { %v171_v26 = vld [vmem:[#allocation2] sm:$0xf] }
 0x1eb   : > { %174 = vst [vmem:[%s108_s21] sm:$0xf] %v171_v26 }
 0x1f2   : > { %v200_v27 = vld [vmem:[%s108_s21] sm:$0xf] }
 0x1f3   : > { %201 = vst [vmem:[%s183_s25] sm:$0xf] %v200_v27 }
 0x1f4 PF: > { %s7_s8 = sadd.s32 1, %s337_s8   ;;  %s399_s6 = smov %s333_s7 }
 0x1f5   : > { %p4_p5 = scmp.ge.s32.totalorder %s7_s8, 4   ;;  %s400_s7 = smov %s402_s10 }
 0x1f7   :  { %6 = sbr.rel (!%p4_p5) target bundleno = 2 (0x2), region = 112 }

// kernel: reverse
= control target key start
LH: loop header
LB: loop body
LE: loop exit
PB: predicated region body
PF: predicated region fallthrough
CT: control target
= control target key end

     0   :  { %v2_v0 = vlaneseq  ;;  %s112_s0 = inlined_call_operand.vmem [shape: f32[2,3], index: 0, kind: input, shape index: {}]   ;;  %s113_s1 = inlined_call_operand.vmem [shape: f32[2,3], index: 1, kind: output, shape index: {}]  }
   0x2   :  { %v3_v1 = vsub.s32 2, %v2_v0 }
   0x4   :  { %4 = vset.pattern.permute.xlu0 %v3_v1 }
   0x5   :  { %v21_v2 = vld [vmem:[%s112_s0] sm:$0x3] }
   0x6   :  { %22 = vst [vmem:[#allocation1] sm:$0x3] %v21_v2 }
   0xd   :  { %v41_v3 = vld [vmem:[#allocation1] sm:$0x3] }
   0xe   :  { %42 = vst [vmem:[#allocation0] sm:$0x3] %v41_v3 }
  0x15   :  { %v43_v4 = vld [vmem:[#allocation0] sm:$0xff] }
  0x16   :  { %44 = vperm.xlu0 %4, %v43_v4  }
  0x91   :  { %v45_v5 = vpop.permute.xlu0 %44 }
  0x92   :  { %46 = vst [vmem:[#allocation2] sm:$0xff] %v45_v5 }
  0x99   :  { %v51_v6 = vld [vmem:[#allocation2] sm:$0x3] }
  0x9a   :  { %54 = vst [vmem:[#allocation3] sm:$0x3] %v51_v6 }
  0xa1   :  { %v71_v7 = vld [vmem:[#allocation3] sm:$0x3] }
  0xa2   :  { %72 = vst [vmem:[%s113_s1] sm:$0x3] %v71_v7 }

// kernel: custom-call.16
= control target key start
LH: loop header
LB: loop body
LE: loop exit
PB: predicated region body
PF: predicated region fallthrough
CT: control target
= control target key end

     0   :  { %s2178_s0 = inlined_call_operand.vmem [shape: f32[2,2,2], index: 0, kind: input, shape index: {}]   ;;  %s2179_s1 = inlined_call_operand.vmem [shape: f32[2,2,2], index: 1, kind: input, shape index: {}]   ;;  %s2180_s2 = inlined_call_operand.vmem [shape: f32[2,2,2], index: 2, kind: input, shape index: {}]   ;;  %s2181_s3 = inlined_call_operand.vmem [shape: f32[2,2,2], index: 3, kind: input, shape index: {}]   ;;  %s2182_s4 = inlined_call_operand.vmem [shape: f32[2,2], index: 4, kind: output, shape index: {0}]   ;;  %s2183_s5 = inlined_call_operand.vmem [shape: f32[2,2], index: 5, kind: output, shape index: {1}]   ;;  %s2184_s6 = inlined_call_operand.hbm [shape: f32[2,2,2], index: 6, kind: output, shape index: {2}]   ;;  %s2185_s7 = inlined_call_operand.hbm [shape: f32[2,2,2], index: 7, kind: output, shape index: {3}]   ;;  %s2186_s8 = inlined_call_operand.hbm [shape: f32[2,2,2], index: 8, kind: output, shape index: {4}]   ;;  %s2187_s9 = inlined_call_operand.hbm [shape: f32[2,2,2], index: 9, kind: output, shape index: {5}]  }
   0x1   :  { %2188 = sst [smem:[#allocation40_spill]] %s2178_s0 }
   0x2   :  { %2189 = sst [smem:[#allocation41_spill]] %s2179_s1 }
   0x3   :  { %11 = vsyncpa [#allocation14], 0 }
   0x4   :  { %13 = vsyncpa [#allocation14 + $0x1], 0 }
   0x5   :  { %14 = vsyncpa [#allocation17], 0 }
   0x6   :  { %16 = vsyncpa [#allocation17 + $0x1], 0 }
   0x7   :  { %17 = vsyncpa [#allocation22], 0 }
   0x8   :  { %19 = vsyncpa [#allocation22 + $0x1], 0  ;;  %s1779_s30 = smov 0   ;;  %s1781_s10 = smov 0  }
   0x9   :  { %s1783_s11 = smov 0  }
   0xa LB: > { %s1795_s12 = sadd.s32 4294967295, %s1712_s11   ;;  %s1799_s14 = sadd.s32 1, %s1712_s11   ;;  %s1712_s11 = sphi %s1783_s11, %s2211_s11   ;;  %s1708_s10 = sphi %s1781_s10, %s2210_s10   ;;  %s1704_s30 = sphi %s1779_s30, %s2209_s30  }
   0xb   : > { %s29_s15 = sshrl.u32 %s1712_s11, 3  ;;  %s30_s16 = sshrl.u32 %s1799_s14, 3 }
   0xc   : > { %s34_s17 = sadd.s32 1, %s1708_s10  ;;  %s31_s18 = ssub.s32 %s29_s15, %s30_s16 }
   0xd   : > { %p44_p0 = scmp.ne.s32.totalorder %s1708_s10, %s1704_s30  ;;  %p32_p1 = scmp.eq.s32.totalorder %s31_s18, 0 }
   0xe   : > { %p45_p2 = scmp.eq.s32.totalorder %s1795_s12, 1  ;;  %p1468_p4 = scmp.ge.s32.totalorder %s1712_s11, 2 }
   0xf   : > { %s1808_s19 = scalar_select %p32_p1, %s1708_s10, %s34_s17  }
  0x10   : > { %p1810_p3 = por %p45_p2, %p44_p0  ;;  %95 = sbr.rel (%p1468_p4) target bundleno = 29 (0x1d), region = 16 }
  0x11   : > { %2190 = sst [smem:[#allocation39_spill]] %s1808_s19  ;;  %s97_s21 = sand.u32 (!%p1468_p4), 1, %s1712_s11  }
  0x12   : > { %s1470_s22 = sshll.u32 (!%p1468_p4), %s1712_s11, 1  ;;  %s1469_s23 = sshll.u32 (!%p1468_p4), %s97_s21, 1 }
  0x13   : > { %s2192_s0 = sld [smem:[#allocation40_spill]] (!%p1468_p4)  ;;  %s99_s27 = scalar_lea.vmem (!%p1468_p4), [#allocation1], %s1469_s23 }
  0x14   : > { %s2193_s1 = sld [smem:[#allocation41_spill]] (!%p1468_p4)  ;;  %s179_s18 = scalar_lea.vmem (!%p1468_p4), %s2180_s2, %s1470_s22 }
  0x15   : > { %s138_s13 = scalar_lea.vmem [#allocation3], %s1469_s23  ;;  %v196_v2 = vld [vmem:[%s179_s18] sm:$0x3]  ;;  %s218_s24 = scalar_lea.vmem %s2181_s3, %s1470_s22 }
  0x16   : > { %s177_s25 = scalar_lea.vmem [#allocation5], %s1469_s23  ;;  %v235_v3 = vld [vmem:[%s218_s24] sm:$0x3] }
  0x17   : > { %197 = vst [vmem:[%s177_s25] sm:$0x3] %v196_v2 }
  0x19   : > { %s101_s26 = scalar_lea.vmem %s2192_s0, %s1470_s22 }
  0x1a   : > { %v118_v0 = vld [vmem:[%s101_s26] sm:$0x3]  ;;  %s140_s15 = scalar_lea.vmem %s2193_s1, %s1470_s22  ;;  %s216_s26 = scalar_lea.vmem [#allocation7], %s1469_s23 }
  0x1b   : > { %119 = vst [vmem:[%s99_s27] sm:$0x3] %v118_v0  ;;  %v157_v1 = vld [vmem:[%s140_s15] sm:$0x3]  ;;  %236 = vst [vmem:[%s216_s26] sm:$0x3] %v235_v3 }
  0x1c   : > { %158 = vst [vmem:[%s138_s13] sm:$0x3] %v157_v1 }
  0x1d PF: > { %p1477_p5 = scmp.ge.s32.totalorder %s1712_s11, 1  ;;  %p253_p6 = scmp.lt.s32.totalorder %s1712_s11, 3 }
  0x1f   : > { %p254_p7 = pnand %p1477_p5, %p253_p6 }
  0x21   : > { %257 = sbr.rel (%p254_p7) target bundleno = 1086 (0x43e), region = 140 }
  0x26   : > { %s1834_s13 = sand.u32 1, %s1795_s12   ;;  %s294_s27 = sand.u32 1, %s1704_s30   ;;  %v362_v4 = vlaneseq  ;;  %v1722_v5 = vmov 0.0  }
  0x27   : > { %s1838_s19 = sshll.u32 %s1834_s13, 1  ;;  %s1840_s22 = sshll.u32 %s294_s27, 1  ;;  %357 = vst [vmem:[#allocation12] sm:$0xff] %v1722_v5  ;;  %358 = vst [vmem:[#allocation15] sm:$0xff] %v1722_v5 }
  0x28   : > { %359 = vst [vmem:[#allocation18] sm:$0xff] %v1722_v5  ;;  %360 = vst [vmem:[#allocation20] sm:$0xff] %v1722_v5  ;;  %v1842_v6 = vand.u32 127, %v362_v4  ;;  %v1844_v7 = vshrl.u32 %v362_v4, 7  ;;  %s278_s23 = scalar_lea.vmem [#allocation1], %s1838_s19  ;;  %s282_s30 = scalar_lea.vmem [#allocation3], %s1838_s19 }
  0x29   : > { %v326_v8 = vld [vmem:[%s278_s23] sm:$0x3]  ;;  %v331_v9 = vld [vmem:[%s282_s30] sm:$0x3]  ;;  %s286_s28 = scalar_lea.vmem [#allocation5], %s1838_s19  ;;  %s290_s29 = scalar_lea.vmem [#allocation7], %s1838_s19 }
  0x2a   : > { %327 = vst [vmem:[#allocation0] sm:$0x3] %v326_v8  ;;  %332 = vst [vmem:[#allocation2] sm:$0x3] %v331_v9  ;;  %v336_v10 = vld [vmem:[%s286_s28] sm:$0x3]  ;;  %v364_v6 = vmov %v1842_v6  ;;  %v367_v7 = vmov %v1844_v7 }
  0x2b   : > { %v341_v11 = vld [vmem:[%s290_s29] sm:$0x3]  ;;  %337 = vst [vmem:[#allocation4] sm:$0x3] %v336_v10  ;;  %v377_v6 = vmov %v1842_v6  ;;  %v380_v7 = vmov %v1844_v7  ;;  %s345_s15 = smov [#allocation23]  ;;  %s348_s16 = smov [#allocation24]  ;;  %vm371_vm0 = vcmp.eq.s32.totalorder %v367_v7, %v364_v6 }
  0x2c   : > { %342 = vst [vmem:[#allocation6] sm:$0x3] %v341_v11  ;;  %vm384_vm1 = vcmp.eq.s32.totalorder %v380_v7, %v377_v6  ;;  %s361_s17 = smov [#allocation12]  ;;  %s374_s18 = smov [#allocation20]  ;;  %vm1357_vm2 = vcmp.lt.s32.totalorder %v1842_v6, 2  ;;  %v1349_v6 = vmov %v1842_v6  ;;  %v1352_v7 = vmov %v1844_v7 }
  0x2d   : > { %s351_s21 = smov [#allocation25]  ;;  %s354_s24 = smov [#allocation26]  ;;  %vm1362_vm3 = vcmp.eq.s32.totalorder %v1352_v7, %v1349_v6  ;;  %v1400_v6 = vmov %v1842_v6  ;;  %v1369_v7 = vmov %v1844_v7 }
  0x2e   : > { %v368_v12 = vld [vmem:[%s361_s17] sm:$0x3]  ;;  %s1353_s29 = smov [#allocation23]  ;;  %s1370_s0 = smov [#allocation24]  ;;  %v1366_v6 = vmov %v1842_v6  ;;  %v1403_v7 = vmov %v1844_v7 }
  0x2f   : > { %v381_v13 = vld [vmem:[%s374_s18] sm:$0x3]  ;;  %v372_v16 = vsel %vm371_vm0, 1.0, %v368_v12  ;;  %v1383_v6 = vmov %v1842_v6  ;;  %v1386_v7 = vmov %v1844_v7  ;;  %vm1413_vm4 = vcmp.eq.s32.totalorder %v1403_v7, %v1400_v6 }
  0x30   : > { %v385_v17 = vsel %vm384_vm1, 1.0, %v381_v13  ;;  %373 = vst [vmem:[%s361_s17] sm:$0x3] %v372_v16 }
  0x31   : > { %v346_v14 = vld [vmem:[#allocation0] sm:$0xff]  ;;  %v349_v15 = vld [vmem:[#allocation2] sm:$0xff]  ;;  %386 = vst [vmem:[%s374_s18] sm:$0x3] %v385_v17 }
  0x32   : > { %347 = vst [vmem:[%s345_s15] sm:$0xff] %v346_v14  ;;  %350 = vst [vmem:[%s348_s16] sm:$0xff] %v349_v15  ;;  %v352_v18 = vld [vmem:[#allocation4] sm:$0xff]  ;;  %s1387_s15 = smov [#allocation25]  ;;  %s1404_s16 = smov [#allocation26] }
  0x33   : > { %v355_v19 = vld [vmem:[#allocation6] sm:$0xff]  ;;  %353 = vst [vmem:[%s351_s21] sm:$0xff] %v352_v18 }
  0x34   : > { %356 = vst [vmem:[%s354_s24] sm:$0xff] %v355_v19 }
  0x39   : > { %v1359_v20 = vld [vmem:[%s1353_s29] sm:$0x3] }
  0x3a   : > { %v1376_v21 = vld [vmem:[%s1370_s0] sm:$0x3]  ;;  %v1360_v22 = vsel %vm1357_vm2, %v1359_v20, 0.0 }
  0x3b   : > { %v1377_v23 = vsel %vm1357_vm2, %v1376_v21, 0.0  ;;  %v1393_v24 = vld [vmem:[%s1387_s15] sm:$0x3]  ;;  %v1361_v26 = vmul.f32 %v1360_v22, %v1360_v22 }
  0x3c   : > { %v1410_v25 = vld [vmem:[%s1404_s16] sm:$0x3]  ;;  %v1378_v27 = vmul.f32 %v1377_v23, %v1377_v23  ;;  %v1394_v28 = vsel %vm1357_vm2, %v1393_v24, 0.0 }
  0x3d   : > { %v1411_v29 = vsel %vm1357_vm2, %v1410_v25, 0.0  ;;  %v1395_v30 = vmul.f32 %v1394_v28, %v1394_v28  ;;  %v1363_v33 = vsel %vm1362_vm3, 0.0, %v1361_v26 }
  0x3e   : > { %v1380_v31 = vadd.f32 %v1378_v27, %v1361_v26  ;;  %v1412_v32 = vmul.f32 %v1411_v29, %v1411_v29  ;;  %v1379_v34 = vadd.f32 %v1378_v27, %v1363_v33 }
  0x40   : > { %v1397_v35 = vadd.f32 %v1395_v30, %v1380_v31  ;;  %v1396_v36 = vadd.f32 %v1395_v30, %v1379_v34  ;;  %v1414_v37 = vsel %vm1413_vm4, 0.0, %v1412_v32 }
  0x42   : > { %v1416_v38 = vadd.f32 %v1412_v32, %v1397_v35  ;;  %v1415_v39 = vadd.f32 %v1414_v37, %v1396_v36 }
  0x44   : > { %1417 = vadd.xlane.f32.xlu0 %v1416_v38 }
  0x48   : > { %1425 = vadd.xlane.f32.xlu0 %v1415_v39 }
  0xcd   : > { %v1418_v40 = vpop.xlane.xlu0 %1417 }
  0xce   : > { %v1419_v41 = vrot.slane %v1418_v40, 4 }
  0xd0   : > { %v1420_v42 = vadd.f32 %v1419_v41, %v1418_v40 }
  0xd1   : > { %v1426_v43 = vpop.xlane.xlu0 %1425 }
  0xd2   : > { %v1421_v44 = vrot.slane %v1420_v42, 2  ;;  %v1427_v45 = vrot.slane %v1426_v43, 4 }
  0xd4   : > { %v1428_v46 = vadd.f32 %v1427_v45, %v1426_v43  ;;  %v1422_v47 = vadd.f32 %v1421_v44, %v1420_v42 }
  0xd6   : > { %v1429_v48 = vrot.slane %v1428_v46, 2  ;;  %v1423_v50 = vrot.slane %v1422_v47, 1 }
  0xd8   : > { %v1430_v49 = vadd.f32 %v1429_v48, %v1428_v46  ;;  %v1424_v53 = vadd.f32 %v1423_v50, %v1422_v47 }
  0xda   : > { %v1431_v51 = vrot.slane %v1430_v49, 1 }
  0xdc   : > { %v1432_v52 = vadd.f32 %v1431_v51, %v1430_v49 }
  0xde   : > { %1518 = vpush %v1432_v52 }
  0xdf   : > { %1520 = vpush %v1424_v53 }
 0x10f   : > { %s1519_s0 = spop %1518 }
 0x110   : > { %s1521_s17 = spop %1520 }
 0x111   : > { %s1435_s18 = smul.f32 1e-10, %s1521_s17 }
 0x113   : > { %p1436_p8 = scmp.le.f32.partialorder %s1519_s0, %s1435_s18 }
 0x114   : > { %s1878_s21 = smov (!%p1436_p8), 0  }
 0x115   : > { %1439 = sbr.rel (%p1436_p8) target bundleno = 959 (0x3bf), region = 349 }
 0x11a LB: >> { %s1883_s24 = smov 0   ;;  %s1716_s21 = sphi %s1878_s21, %s2194_s21  }
 0x11b LB: >>> { %s491_s29 = smov [#allocation23]  ;;  %v495_v6 = vmov %v1842_v6  ;;  %v498_v7 = vmov %v1844_v7  ;;  %s511_s15 = smov [#allocation24]  ;;  %vm814_vm14 = vcmp.eq.s32.totalorder %v1844_v7, 0  ;;  %vm826_vm15 = vcmp.eq.s32.totalorder %v1844_v7, 1  ;;  %s1720_s24 = sphi %s1883_s24, %s490_s24  }
 0x11c   : >>> { %v515_v6 = vmov %v1842_v6  ;;  %v518_v7 = vmov %v1844_v7  ;;  %v499_v54 = vld [vmem:[%s491_s29] sm:$0x3]  ;;  %vm502_vm5 = vcmp.eq.s32.totalorder %v498_v7, %v495_v6  ;;  %s531_s16 = smov [#allocation26]  ;;  %s492_s0 = smov [#allocation27] }
 0x11d   : >>> { %vm522_vm6 = vcmp.eq.s32.totalorder %v518_v7, %v515_v6  ;;  %v535_v6 = vmov %v1842_v6  ;;  %v538_v7 = vmov %v1844_v7  ;;  %v503_v55 = vsel %vm502_vm5, %v499_v54, 0.0  ;;  %v519_v56 = vld [vmem:[%s511_s15] sm:$0x3]  ;;  %s512_s17 = smov [#allocation28]  ;;  %s532_s18 = smov [#allocation29] }
 0x11e   : >>> { %vm542_vm7 = vcmp.eq.s32.totalorder %v538_v7, %v535_v6  ;;  %v504_v57 = vrot.slane %v503_v55, 4  ;;  %v523_v58 = vsel %vm522_vm6, %v519_v56, 0.0  ;;  %v539_v59 = vld [vmem:[%s531_s16] sm:$0x3]  ;;  %s555_s29 = smov [#allocation28]  ;;  %s553_s15 = smov [#allocation27]  ;;  %v604_v6 = vmov %v1842_v6 }
 0x11f   : >>> { %v524_v60 = vrot.slane %v523_v58, 4  ;;  %v543_v61 = vsel %vm542_vm7, %v539_v59, 0.0  ;;  %s557_s16 = smov [#allocation29]  ;;  %v607_v7 = vmov %v1844_v7  ;;  %v619_v6 = vmov %v1842_v6  ;;  %s1900_s26 = smov [#allocation24] }
 0x120   : >>> { %v505_v62 = vadd.f32 %v504_v57, %v503_v55  ;;  %v544_v63 = vrot.slane %v543_v61, 4  ;;  %v622_v7 = vmov %v1844_v7  ;;  %vm609_vm12 = vcmp.eq.s32.totalorder %v607_v7, %v604_v6  ;;  %s1902_s25 = smov [#allocation25]  ;;  %s1908_s28 = smov [#allocation15]  ;;  %v639_v54 = vld [vmem:[%s1900_s26] sm:$0x3] }
 0x121   : >>> { %v525_v0 = vadd.f32 %v524_v60, %v523_v58  ;;  %vm624_vm13 = vcmp.eq.s32.totalorder %v622_v7, %v619_v6  ;;  %s854_s30 = smov [#allocation34]  ;;  %s1914_s23 = smov [#allocation20]  ;;  %v640_v55 = vld [vmem:[%s1902_s25] sm:$0x3]  ;;  %v717_v6 = vmov %v1842_v6  ;;  %v720_v7 = vmov %v1844_v7 }
 0x122   : >>> { %v506_v1 = vrot.slane %v505_v62, 2  ;;  %v545_v2 = vadd.f32 %v544_v63, %v543_v61  ;;  %v863_v58 = vld [vmem:[%s1908_s28] sm:$0x3]  ;;  %s632_s27 = smov [#allocation35]  ;;  %s856_s1 = smov [#allocation35]  ;;  %v731_v6 = vmov %v1842_v6  ;;  %v734_v7 = vmov %v1844_v7 }
 0x123   : >>> { %v526_v3 = vrot.slane %v525_v0, 2  ;;  %v865_v61 = vld [vmem:[%s1914_s23] sm:$0x3]  ;;  %vm724_vm0 = vcmp.eq.s32.totalorder %v720_v7, %v717_v6  ;;  %v690_v6 = vmov %v1842_v6  ;;  %v693_v7 = vmov %v1844_v7  ;;  %s490_s24 = sadd.s32 1, %s1720_s24  }
 0x124   : >>> { %v507_v4 = vadd.f32 %v506_v1, %v505_v62  ;;  %v546_v5 = vrot.slane %v545_v2, 2  ;;  %v704_v6 = vmov %v1842_v6  ;;  %v707_v7 = vmov %v1844_v7  ;;  %p487_p9 = scmp.ge.s32.totalorder %s490_s24, 3  }
 0x125   : >>> { %v527_v8 = vadd.f32 %v526_v3, %v525_v0  ;;  %vm739_vm1 = vcmp.eq.s32.totalorder %v734_v7, %v731_v6  ;;  %vm698_vm3 = vcmp.eq.s32.totalorder %v693_v7, %v690_v6  ;;  %vm711_vm4 = vcmp.eq.s32.totalorder %v707_v7, %v704_v6 }
 0x126   : >>> { %v508_v9 = vrot.slane %v507_v4, 1  ;;  %v547_v10 = vadd.f32 %v546_v5, %v545_v2  ;;  %vm753_vm5 = vcmp.eq.s32.totalorder %v1842_v6, 0  ;;  %vm757_vm6 = vcmp.eq.s32.totalorder %v1842_v6, 1 }
 0x127   : >>> { %v528_v11 = vrot.slane %v527_v8, 1  ;;  %v391_v6 = vmov (%p487_p9), %v1842_v6  ;;  %v394_v7 = vmov (%p487_p9), %v1844_v7 }
 0x128   : >>> { %v509_v12 = vadd.f32 %v508_v9, %v507_v4  ;;  %v548_v13 = vrot.slane %v547_v10, 1  ;;  %v444_v6 = vmov (%p487_p9), %v1842_v6  ;;  %vm406_vm7 = vcmp.eq.s32.totalorder (%p487_p9), %v394_v7, %v391_v6 }
 0x129   : >>> { %v529_v14 = vadd.f32 %v528_v11, %v527_v8  ;;  %v447_v7 = vmov (%p487_p9), %v1844_v7  ;;  %v410_v6 = vmov (%p487_p9), %v1842_v6 }
 0x12a   : >>> { %510 = vst [vmem:[%s492_s0] sm:$0x1] %v509_v12  ;;  %v549_v15 = vadd.f32 %v548_v13, %v547_v10  ;;  %s592_s0 = smov [#allocation30]  ;;  %v413_v7 = vmov (%p487_p9), %v1844_v7  ;;  %v427_v6 = vmov (%p487_p9), %v1842_v6 }
 0x12b   : >>> { %530 = vst [vmem:[%s512_s17] sm:$0x1] %v529_v14  ;;  %s594_s17 = smov [#allocation31]  ;;  %v430_v7 = vmov (%p487_p9), %v1844_v7 }
 0x12c   : >>> { %550 = vst [vmem:[%s532_s18] sm:$0x1] %v549_v15  ;;  %s551_s18 = smov [#allocation32] }
 0x12d   : >>> { %s596_s18 = smov %s551_s18 }
 0x131   : >>> { %v554_v18 = vld [vmem:[%s553_s15] sm:$0xff]  ;;  %s600_s15 = smov [#allocation32] }
 0x132   : >>> { %v556_v16 = vld [vmem:[%s555_s29] sm:$0xff]  ;;  %v577_v33 = vand.u32 2147483647, %v554_v18  ;;  %s552_s29 = smov [#allocation33] }
 0x133   : >>> { %v560_v17 = vmul.f32 2.0, %v556_v16  ;;  %v558_v19 = vld [vmem:[%s557_s16] sm:$0xff]  ;;  %v578_v36 = vand.u32 2147483647, %v556_v16  ;;  %s598_s29 = smov %s552_s29  ;;  %s615_s16 = smov [#allocation33] }
 0x134   : >>> { %v559_v20 = vsub.f32 %v558_v19, %v554_v18  ;;  %v579_v34 = vand.u32 2147483647, %v558_v19 }
 0x135   : >>> { %1574 = vrcp.f32 %v560_v17 }
 0x136   : >>> { %v580_v35 = vmin.f32 %v577_v33, %v579_v34 }
 0x138   : >>> { %v581_v37 = vmul.f32 1.1920929e-08, %v580_v35 }
 0x13a   : >>> { %vm582_vm11 = vcmp.le.f32.partialorder %v578_v36, %v581_v37 }
 0x142   : >>> { %v1575_v21 = vpop.eup %1574 }
 0x143   : >>> { %v562_v22 = vmul.f32 %v1575_v21, %v559_v20 }
 0x145   : >>> { %v564_v23 = vmul.f32 %v562_v22, %v562_v22  ;;  %vm563_vm10 = vcmp.ge.f32.partialorder %v562_v22, 0.0 }
 0x147   : >>> { %v565_v24 = vadd.f32 1.0, %v564_v23 }
 0x149   : >>> { %1576 = vrsqrt.f32 %v565_v24  ;;  %vm568_vm8 = vcmp.eq.f32.partialorder %v565_v24, inf  ;;  %v571_v26 = vand.u32 2147483648, %v565_v24  ;;  %vm570_vm9 = vcmp.eq.f32.partialorder %v565_v24, 0.0 }
 0x156   : >>> { %v1577_v25 = vpop.eup %1576 }
 0x157   : >>> { %v567_v27 = vmul.f32 %v1577_v25, %v565_v24 }
 0x159   : >>> { %v569_v28 = vsel %vm568_vm8, %v565_v24, %v567_v27  ;;  %vm459_vm8 = vcmp.eq.s32.totalorder (%p487_p9), %v447_v7, %v444_v6 }
 0x15a   : >>> { %v572_v29 = vsel %vm570_vm9, %v571_v26, %v569_v28 }
 0x15b   : >>> { %v573_v30 = vxor.u32 2147483648, %v572_v29 }
 0x15d   : >>> { %v574_v31 = vsel %vm563_vm10, %v572_v29, %v573_v30 }
 0x15e   : >>> { %v575_v32 = vadd.f32 %v574_v31, %v562_v22 }
 0x160   : >>> { %1578 = vrcp.f32 %v575_v32 }
 0x16d   : >>> { %v1579_v38 = vpop.eup %1578 }
 0x16e   : >>> { %v583_v39 = vsel %vm582_vm11, 0.0, %v1579_v38 }
 0x16f   : >>> { %v584_v40 = vmul.f32 %v583_v39, %v583_v39  ;;  %v588_v41 = vmul.f32 %v583_v39, %v556_v16 }
 0x171   : >>> { %v585_v42 = vadd.f32 1.0, %v584_v40  ;;  %v589_v43 = vsub.f32 %v554_v18, %v588_v41  ;;  %v591_v44 = vadd.f32 %v588_v41, %v558_v19 }
 0x173   : >>> { %1580 = vrsqrt.f32 %v585_v42  ;;  %593 = vst [vmem:[%s592_s0] sm:$0xff] %v589_v43  ;;  %595 = vst [vmem:[%s594_s17] sm:$0xff] %v591_v44  ;;  %s613_s0 = smov [#allocation34]  ;;  %s630_s17 = smov [#allocation34] }
 0x180   : >>> { %v1581_v45 = vpop.eup %1580 }
 0x181   : >>> { %597 = vst [vmem:[%s596_s18] sm:$0xff] %v1581_v45  ;;  %v587_v46 = vmul.f32 %v1581_v45, %v583_v39  ;;  %s1898_s18 = smov [#allocation23] }
 0x182   : >>> { %v638_v53 = vld [vmem:[%s1898_s18] sm:$0x3] }
 0x183   : >>> { %599 = vst [vmem:[%s598_s29] sm:$0xff] %v587_v46  ;;  %s628_s29 = smov [#allocation35] }
 0x188   : >>> { %v601_v47 = vld [vmem:[%s600_s15] ss:$0 sm:$0xff]  ;;  %s1904_s15 = smov [#allocation26] }
 0x189   : >>> { %v610_v48 = vsel %vm609_vm12, %v601_v47, 0.0  ;;  %v641_v56 = vld [vmem:[%s1904_s15] sm:$0x3] }
 0x18a   : >>> { %611 = vadd.xlane.f32.xlu0 %v610_v48  ;;  %v616_v49 = vld [vmem:[%s615_s16] ss:$0 sm:$0xff]  ;;  %s1906_s16 = smov [#allocation12] }
 0x18b   : >>> { %v625_v50 = vsel %vm624_vm13, %v616_v49, 0.0  ;;  %v862_v57 = vld [vmem:[%s1906_s16] sm:$0x3] }
 0x18e   : >>> { %626 = vadd.xlane.f32.xlu0 %v625_v50 }
 0x213   : >>> { %v612_v51 = vpop.xlane.xlu0 %611 }
 0x214   : >>> { %614 = vst [vmem:[%s613_s0] sm:$0xff] %v612_v51  ;;  %s1910_s0 = smov [#allocation18] }
 0x215   : >>> { %v864_v59 = vld [vmem:[%s1910_s0] sm:$0x3] }
 0x217   : >>> { %v627_v52 = vpop.xlane.xlu0 %626 }
 0x218   : >>> { %629 = vst [vmem:[%s628_s29] sm:$0xff] %v627_v52  ;;  %s1934_s29 = smov [#allocation26] }
 0x21b   : >>> { %v631_v60 = vld [vmem:[%s630_s17] sm:$0xff]  ;;  %s1932_s17 = smov [#allocation25] }
 0x21c   : >>> { %v855_v62 = vld [vmem:[%s854_s30] sm:$0xff]  ;;  %v642_v63 = vmul.f32 %v638_v53, %v631_v60  ;;  %v645_v0 = vmul.f32 %v639_v54, %v631_v60  ;;  %v649_v1 = vmul.f32 %v640_v55, %v631_v60  ;;  %v652_v2 = vmul.f32 %v641_v56, %v631_v60  ;;  %s1930_s30 = smov [#allocation12] }
 0x21d   : >>> { %v866_v3 = vmul.f32 %v862_v57, %v855_v62  ;;  %v869_v4 = vmul.f32 %v863_v58, %v855_v62  ;;  %v873_v5 = vmul.f32 %v864_v59, %v855_v62  ;;  %v876_v8 = vmul.f32 %v865_v61, %v855_v62 }
 0x21f   : >>> { %v633_v9 = vld [vmem:[%s632_s27] sm:$0xff]  ;;  %s660_s27 = smov [#allocation33] }
 0x220   : >>> { %v857_v10 = vld [vmem:[%s856_s1] sm:$0xff]  ;;  %v643_v11 = vmul.f32 %v640_v55, %v633_v9  ;;  %v646_v12 = vmul.f32 %v641_v56, %v633_v9  ;;  %v648_v13 = vmul.f32 %v638_v53, %v633_v9  ;;  %v651_v14 = vmul.f32 %v639_v54, %v633_v9  ;;  %s658_s1 = smov [#allocation32] }
 0x221   : >>> { %v867_v15 = vmul.f32 %v864_v59, %v857_v10  ;;  %v870_v16 = vmul.f32 %v865_v61, %v857_v10  ;;  %v872_v17 = vmul.f32 %v862_v57, %v857_v10  ;;  %v875_v18 = vmul.f32 %v863_v58, %v857_v10  ;;  %v659_v27 = vld [vmem:[%s658_s1] ss:$0 sm:$0xff]  ;;  %s687_s1 = smov [#allocation30] }
 0x222   : >>> { %v644_v19 = vsub.f32 %v642_v63, %v643_v11  ;;  %v647_v20 = vsub.f32 %v645_v0, %v646_v12  ;;  %v650_v21 = vadd.f32 %v649_v1, %v648_v13  ;;  %v653_v22 = vadd.f32 %v652_v2, %v651_v14  ;;  %v661_v28 = vld [vmem:[%s660_s27] ss:$0 sm:$0xff]  ;;  %s686_s27 = smov [#allocation23] }
 0x223   : >>> { %v868_v23 = vsub.f32 %v866_v3, %v867_v15  ;;  %v871_v24 = vsub.f32 %v869_v4, %v870_v16  ;;  %v874_v25 = vadd.f32 %v873_v5, %v872_v17  ;;  %v877_v26 = vadd.f32 %v876_v8, %v875_v18  ;;  %v694_v63 = vld [vmem:[%s687_s1] ss:$0 sm:$0xff]  ;;  %s930_s1 = sadd.s32 (%p487_p9), 1, %s1716_s21  }
 0x224   : >>> { %655 = vst [vmem:[%s1900_s26] sm:$0x3] %v647_v20  ;;  %657 = vst [vmem:[%s1904_s15] sm:$0x3] %v653_v22  ;;  %s1936_s26 = smov [#allocation23]  ;;  %s728_s15 = smov [#allocation31] }
 0x225   : >>> { %654 = vst [vmem:[%s1898_s18] sm:$0x3] %v644_v19  ;;  %656 = vst [vmem:[%s1902_s25] sm:$0x3] %v650_v21  ;;  %s1938_s25 = smov [#allocation18]  ;;  %s1946_s18 = smov [#allocation24]  ;;  %v735_v59 = vld [vmem:[%s728_s15] ss:$0 sm:$0xff] }
 0x226   : >>> { %878 = vst [vmem:[%s1906_s16] sm:$0x3] %v868_v23  ;;  %879 = vst [vmem:[%s1908_s28] sm:$0x3] %v871_v24  ;;  %s1940_s28 = smov [#allocation15]  ;;  %s714_s16 = smov [#allocation25] }
 0x227   : >>> { %880 = vst [vmem:[%s1910_s0] sm:$0x3] %v874_v25  ;;  %881 = vst [vmem:[%s1914_s23] sm:$0x3] %v877_v26  ;;  %s1944_s23 = smov [#allocation20]  ;;  %s727_s0 = smov [#allocation26] }
 0x228   : >>> { %s830_s15 = smov [#allocation24]  ;;  %p483_p10 = scmp.ge.s32.totalorder (%p487_p9), %s930_s1, 15 }
 0x229   : >> { %s2194_s21 = smov (%p487_p9), %s930_s1 }
 0x22b   : >>> { %v669_v30 = vld [vmem:[%s1934_s29] sm:$0x3] }
 0x22c   : >>> { %v668_v29 = vld [vmem:[%s1932_s17] sm:$0x3]  ;;  %v677_v36 = vmul.f32 %v669_v30, %v661_v28  ;;  %v680_v42 = vmul.f32 %v669_v30, %v659_v27 }
 0x22d   : >>> { %v666_v31 = vld [vmem:[%s1936_s26] sm:$0x3]  ;;  %v676_v35 = vmul.f32 %v668_v29, %v659_v27  ;;  %v679_v37 = vmul.f32 %v668_v29, %v661_v28 }
 0x22e   : >>> { %v884_v32 = vld [vmem:[%s1930_s30] ss:$0 sm:$0xff]  ;;  %v1497_v34 = vld [vmem:[%s1930_s30 + $0x1] ss:$0 sm:$0xff]  ;;  %v670_v48 = vmul.f32 %v666_v31, %v659_v27  ;;  %v673_v49 = vmul.f32 %v666_v31, %v661_v28 }
 0x22f   : >>> { %v1496_v33 = vld [vmem:[%s1930_s30 - $0x1] sm:$0x2]  ;;  %v1499_v40 = vld [vmem:[%s1938_s25 + $0x1] sm:$0x1]  ;;  %v678_v47 = vsub.f32 %v676_v35, %v677_v36  ;;  %v681_v53 = vadd.f32 %v680_v42, %v679_v37 }
 0x230   : >>> { %v891_v38 = vsel %vm814_vm14, %v884_v32, %v1496_v33  ;;  %v895_v39 = vld [vmem:[%s1938_s25] ss:$0 sm:$0xff]  ;;  %v903_v43 = vsel %vm826_vm15, %v1497_v34, %v1499_v40  ;;  %v1501_v45 = vld [vmem:[%s1940_s28 + $0x1] ss:$0 sm:$0xff] }
 0x231   : >>> { %v908_v41 = vld [vmem:[%s1940_s28] ss:$0 sm:$0xff]  ;;  %894 = vst [vmem:[%s1930_s30] sm:$0x3] %v891_v38  ;;  %905 = vst [vmem:[%s1938_s25] sm:$0x3] %v903_v43  ;;  %v1503_v51 = vld [vmem:[%s1944_s23 + $0x1] sm:$0x1] }
 0x232   : >>> { %v1500_v44 = vld [vmem:[%s1940_s28 - $0x1] sm:$0x2]  ;;  %1498 = vst [vmem:[%s1930_s30 + $0x1] sm:$0x1] %v895_v39  ;;  %v927_v54 = vsel %vm826_vm15, %v1501_v45, %v1503_v51  ;;  %684 = vst [vmem:[%s1932_s17] sm:$0x3] %v678_v47  ;;  %s701_s30 = smov [#allocation24] }
 0x233   : >>> { %v919_v46 = vld [vmem:[%s1944_s23] ss:$0 sm:$0xff]  ;;  %v915_v50 = vsel %vm814_vm14, %v908_v41, %v1500_v44  ;;  %685 = vst [vmem:[%s1934_s29] sm:$0x3] %v681_v53  ;;  %s1988_s17 = smov [#allocation25]  ;;  %s1723_s29 = smov 1  }
 0x234   : >>> { %v667_v52 = vld [vmem:[%s1946_s18] sm:$0x3]  ;;  %918 = vst [vmem:[%s1940_s28] sm:$0x3] %v915_v50  ;;  %929 = vst [vmem:[%s1944_s23] sm:$0x3] %v927_v54  ;;  %s743_s25 = smov [#allocation24]  ;;  %s1991_s23 = smov [#allocation26] }
 0x235   : >>> { %v671_v55 = vmul.f32 %v667_v52, %v661_v28  ;;  %v674_v56 = vmul.f32 %v667_v52, %v659_v27  ;;  %1502 = vst [vmem:[%s1940_s28 + $0x1] sm:$0x1] %v919_v46  ;;  %s1724_s28 = smov 127  }
 0x237   : >>> { %v672_v57 = vsub.f32 %v670_v48, %v671_v55  ;;  %v675_v58 = vadd.f32 %v674_v56, %v673_v49 }
 0x239   : >>> { %682 = vst [vmem:[%s1936_s26] sm:$0x3] %v672_v57  ;;  %683 = vst [vmem:[%s1946_s18] sm:$0x3] %v675_v58  ;;  %v721_v60 = vld [vmem:[%s714_s16] sm:$0x3]  ;;  %s742_s26 = smov [#allocation23]  ;;  %s806_s18 = smov [#allocation23] }
 0x23a   : >>> { %v725_v61 = vsel %vm724_vm0, 0.0, %v721_v60  ;;  %v736_v62 = vld [vmem:[%s727_s0] sm:$0x3] }
 0x23b   : >>> { %726 = vst [vmem:[%s714_s16] sm:$0x3] %v725_v61  ;;  %v740_v0 = vsel %vm739_vm1, %v735_v59, %v736_v62  ;;  %s807_s16 = smov [#allocation25] }
 0x23c   : >>> { %741 = vst [vmem:[%s727_s0] sm:$0x3] %v740_v0  ;;  %s831_s0 = smov [#allocation26] }
 0x240   : >>> { %v695_v1 = vld [vmem:[%s686_s27] sm:$0x3] }
 0x241   : >>> { %v708_v2 = vld [vmem:[%s701_s30] sm:$0x3]  ;;  %v699_v3 = vsel %vm698_vm3, %v694_v63, %v695_v1 }
 0x242   : >>> { %v712_v4 = vsel %vm711_vm4, 0.0, %v708_v2  ;;  %700 = vst [vmem:[%s686_s27] sm:$0x3] %v699_v3  ;;  %v780_v5 = vld [vmem:[%s1988_s17] sm:$0x3]  ;;  %s395_s27 = smov (%p487_p9), [#allocation23] }
 0x243   : >>> { %713 = vst [vmem:[%s701_s30] sm:$0x3] %v712_v4  ;;  %781 = vrot.lane.b32.xlu0 %v780_v5, %s1723_s29  ;;  %v776_v11 = vld [vmem:[%s1991_s23] sm:$0x3]  ;;  %s414_s30 = smov (%p487_p9), [#allocation24] }
 0x244   : >>> { %v797_v12 = vld [vmem:[%s1991_s23] sm:$0x3] }
 0x245   : >>> { %v779_v30 = vld [vmem:[%s1988_s17] sm:$0x3] }
 0x249   : >>> { %v748_v8 = vld [vmem:[%s742_s26] sm:$0x3] }
 0x24a   : >>> { %749 = vrot.lane.b32.xlu1 %v748_v8, %s1723_s29  ;;  %v744_v9 = vld [vmem:[%s743_s25] sm:$0x3] }
 0x24b   : >>> { %v765_v10 = vld [vmem:[%s743_s25] sm:$0x3] }
 0x24c   : >>> { %v747_v18 = vld [vmem:[%s742_s26] sm:$0x3] }
 0x24e   : >>> { %745 = vrot.lane.b32.xlu1 %v744_v9, %s1723_s29 }
 0x252   : >>> { %766 = vrot.lane.b32.xlu1 %v765_v10, %s1724_s28 }
 0x256   : >>> { %777 = vrot.lane.b32.xlu1 %v776_v11, %s1723_s29  ;;  %s448_s29 = smov (%p487_p9), [#allocation26] }
 0x25a   : >>> { %798 = vrot.lane.b32.xlu1 %v797_v12, %s1724_s28 }
 0x2b5   : >>> { %v782_v20 = vpop.permute.xlu0 %781 }
 0x2b6   : >>> { %v786_v22 = vsel %vm753_vm5, %v780_v5, %v782_v20 }
 0x2bc   : >>> { %v750_v13 = vpop.permute.xlu1 %749 }
 0x2bd   : >>> { %v754_v14 = vsel %vm753_vm5, %v748_v8, %v750_v13 }
 0x2c0   : >>> { %v746_v15 = vpop.permute.xlu1 %745 }
 0x2c1   : >>> { %v758_v16 = vsel %vm757_vm6, %v746_v15, %v754_v14 }
 0x2c2   : >>> { %v764_v17 = vsel %vm1357_vm2, %v758_v16, 0.0 }
 0x2c3   : >>> { %772 = vst [vmem:[%s742_s26] sm:$0x3] %v764_v17 }
 0x2c4   : >>> { %v767_v19 = vpop.permute.xlu1 %766 }
 0x2c5   : >>> { %v771_v21 = vsel %vm757_vm6, %v747_v18, %v767_v19 }
 0x2c6   : >>> { %773 = vst [vmem:[%s743_s25] sm:$0x3] %v771_v21 }
 0x2c8   : >>> { %v778_v23 = vpop.permute.xlu1 %777 }
 0x2c9   : >>> { %v790_v24 = vsel %vm757_vm6, %v778_v23, %v786_v22 }
 0x2ca   : >>> { %v808_v25 = vld [vmem:[%s806_s18] ss:$0 sm:$0xff]  ;;  %v1489_v27 = vld [vmem:[%s806_s18 + $0x1] ss:$0 sm:$0xff]  ;;  %v796_v29 = vsel %vm1357_vm2, %v790_v24, 0.0 }
 0x2cb   : >>> { %v1488_v26 = vld [vmem:[%s806_s18 - $0x1] sm:$0x2]  ;;  %804 = vst [vmem:[%s1988_s17] sm:$0x3] %v796_v29  ;;  %s431_s17 = smov (%p487_p9), [#allocation25] }
 0x2cc   : >>> { %v815_v28 = vsel %vm814_vm14, %v808_v25, %v1488_v26  ;;  %v799_v31 = vpop.permute.xlu1 %798 }
 0x2cd   : >>> { %818 = vst [vmem:[%s806_s18] sm:$0x3] %v815_v28  ;;  %v832_v32 = vld [vmem:[%s830_s15] ss:$0 sm:$0xff]  ;;  %v1493_v34 = vld [vmem:[%s830_s15 + $0x1] ss:$0 sm:$0xff]  ;;  %v803_v35 = vsel %vm757_vm6, %v779_v30, %v799_v31 }
 0x2ce   : >>> { %v1492_v33 = vld [vmem:[%s830_s15 - $0x1] sm:$0x2]  ;;  %805 = vst [vmem:[%s1991_s23] sm:$0x3] %v803_v35 }
 0x2cf   : >>> { %v839_v36 = vsel %vm814_vm14, %v832_v32, %v1492_v33 }
 0x2d0   : >>> { %842 = vst [vmem:[%s830_s15] sm:$0x3] %v839_v36 }
 0x2d2   : >>> { %v819_v37 = vld [vmem:[%s807_s16] ss:$0 sm:$0xff]  ;;  %v1491_v38 = vld [vmem:[%s807_s16 + $0x1] sm:$0x1] }
 0x2d3   : >>> { %1490 = vst [vmem:[%s806_s18 + $0x1] sm:$0x1] %v819_v37  ;;  %v827_v39 = vsel %vm826_vm15, %v1489_v27, %v1491_v38 }
 0x2d4   : >>> { %829 = vst [vmem:[%s807_s16] sm:$0x3] %v827_v39 }
 0x2d5   : >>> { %v843_v40 = vld [vmem:[%s831_s0] ss:$0 sm:$0xff]  ;;  %v1495_v41 = vld [vmem:[%s831_s0 + $0x1] sm:$0x1] }
 0x2d6   : >>> { %1494 = vst [vmem:[%s830_s15 + $0x1] sm:$0x1] %v843_v40  ;;  %v851_v42 = vsel %vm826_vm15, %v1493_v34, %v1495_v41 }
 0x2d7   : >>> { %853 = vst [vmem:[%s831_s0] sm:$0x3] %v851_v42  ;;  %489 = sbr.rel (!%p487_p9) target bundleno = 283 (0x11b), region = 344 }
 0x2da   : >> { %v401_v43 = vld [vmem:[%s395_s27] sm:$0x3] (%p487_p9) }
 0x2db   : >> { %v402_v45 = vsel (%p487_p9), %vm1357_vm2, %v401_v43, 0.0  ;;  %v437_v47 = vld [vmem:[%s431_s17] sm:$0x3] (%p487_p9) }
 0x2dc   : >> { %v403_v49 = vmul.f32 %v402_v45, %v402_v45  ;;  %v438_v51 = vsel %vm1357_vm2, %v437_v47, 0.0 }
 0x2dd   : >> { %v420_v44 = vld [vmem:[%s414_s30] sm:$0x3]  ;;  %v439_v53 = vmul.f32 %v438_v51, %v438_v51 }
 0x2de   : >> { %v421_v46 = vsel %vm1357_vm2, %v420_v44, 0.0  ;;  %v454_v48 = vld [vmem:[%s448_s29] sm:$0x3]  ;;  %v407_v56 = vsel %vm406_vm7, 0.0, %v403_v49 }
 0x2df   : >> { %v422_v50 = vmul.f32 %v421_v46, %v421_v46  ;;  %v455_v52 = vsel %vm1357_vm2, %v454_v48, 0.0 }
 0x2e0   : >> { %v456_v55 = vmul.f32 %v455_v52, %v455_v52 }
 0x2e1   : >> { %v424_v54 = vadd.f32 %v422_v50, %v403_v49  ;;  %v423_v57 = vadd.f32 %v422_v50, %v407_v56 }
 0x2e2   : >> { %v460_v60 = vsel %vm459_vm8, 0.0, %v456_v55 }
 0x2e3   : >> { %v441_v58 = vadd.f32 %v439_v53, %v424_v54  ;;  %v440_v59 = vadd.f32 %v439_v53, %v423_v57 }
 0x2e5   : >> { %v462_v61 = vadd.f32 %v456_v55, %v441_v58  ;;  %v461_v62 = vadd.f32 %v460_v60, %v440_v59 }
 0x2e7   : >> { %463 = vadd.xlane.f32.xlu0 %v462_v61 }
 0x2eb   : >> { %471 = vadd.xlane.f32.xlu0 %v461_v62 }
 0x370   : >> { %v464_v63 = vpop.xlane.xlu0 %463 }
 0x371   : >> { %v465_v0 = vrot.slane %v464_v63, 4 }
 0x373   : >> { %v466_v1 = vadd.f32 %v465_v0, %v464_v63 }
 0x374   : >> { %v472_v2 = vpop.xlane.xlu0 %471 }
 0x375   : >> { %v467_v3 = vrot.slane %v466_v1, 2  ;;  %v473_v4 = vrot.slane %v472_v2, 4 }
 0x377   : >> { %v474_v5 = vadd.f32 %v473_v4, %v472_v2  ;;  %v468_v8 = vadd.f32 %v467_v3, %v466_v1 }
 0x379   : >> { %v475_v9 = vrot.slane %v474_v5, 2  ;;  %v469_v11 = vrot.slane %v468_v8, 1 }
 0x37b   : >> { %v476_v10 = vadd.f32 %v475_v9, %v474_v5  ;;  %v470_v14 = vadd.f32 %v469_v11, %v468_v8 }
 0x37d   : >> { %v477_v12 = vrot.slane %v476_v10, 1 }
 0x37f   : >> { %v478_v13 = vadd.f32 %v477_v12, %v476_v10 }
 0x381   : >> { %1522 = vpush %v478_v13 }
 0x382   : >> { %1524 = vpush %v470_v14 }
 0x3b2   : >> { %s1523_s24 = spop %1522 }
 0x3b3   : >> { %s1525_s26 = spop %1524 }
 0x3b4   : >> { %s481_s25 = smul.f32 1e-10, %s1525_s26 }
 0x3b6   : >> { %p482_p11 = scmp.le.f32.partialorder %s1523_s24, %s481_s25 }
 0x3b8   : >> { %p484_p12 = por %p483_p10, %p482_p11 }
 0x3ba   : > { %932 = sbr.rel (!%p484_p12) target bundleno = 282 (0x11a), region = 355 }
 0x3bf PF: > { %s937_s28 = smov [#allocation23]  ;;  %v941_v6 = vmov %v1842_v6  ;;  %v944_v7 = vmov %v1844_v7  ;;  %v997_v15 = vld [vmem:[#allocation12] sm:$0x3]  ;;  %v1005_v16 = vld [vmem:[#allocation15] sm:$0x3]  ;;  %s2195_s21 = scalar_lea.vmem [#allocation13], %s1838_s19 }
 0x3c0   : > { %v961_v6 = vmov %v1842_v6  ;;  %v964_v7 = vmov %v1844_v7  ;;  %v945_v17 = vld [vmem:[%s937_s28] sm:$0x3]  ;;  %vm948_vm9 = vcmp.eq.s32.totalorder %v944_v7, %v941_v6  ;;  %1000 = vst [vmem:[%s2195_s21] sm:$0x3] %v997_v15  ;;  %s2196_s23 = scalar_lea.vmem [#allocation16], %s1838_s19  ;;  %s957_s18 = smov [#allocation26] }
 0x3c1   : > { %vm968_vm10 = vcmp.eq.s32.totalorder %v964_v7, %v961_v6  ;;  %1008 = vst [vmem:[%s2196_s23] sm:$0x3] %v1005_v16  ;;  %v1013_v18 = vld [vmem:[#allocation18] sm:$0x3]  ;;  %v949_v19 = vsel %vm948_vm9, %v945_v17, 0.0  ;;  %s2197_s15 = scalar_lea.vmem [#allocation19], %s1838_s19  ;;  %s2198_s16 = scalar_lea.vmem [#allocation21], %s1838_s19 }
 0x3c2   : > { %1016 = vst [vmem:[%s2197_s15] sm:$0x3] %v1013_v18  ;;  %v1021_v20 = vld [vmem:[#allocation20] sm:$0x3]  ;;  %v950_v21 = vrot.slane %v949_v19, 4  ;;  %v965_v22 = vld [vmem:[%s957_s18] sm:$0x3] }
 0x3c3   : > { %1024 = vst [vmem:[%s2198_s16] sm:$0x3] %v1021_v20  ;;  %v969_v23 = vsel %vm968_vm10, %v965_v22, 0.0  ;;  %s933_s0 = sand.u32 7, %s1795_s12   ;;  %s2199_s30 = scalar_lea.vmem [#allocation9], %s1840_s22 }
 0x3c4   : > { %v951_v24 = vadd.f32 %v950_v21, %v949_v19  ;;  %v970_v25 = vrot.slane %v969_v23, 4  ;;  %s934_s1 = scalar_lea.vmem [#allocation8], %s933_s0  ;;  %s936_s27 = scalar_lea.vmem [#allocation10], %s933_s0 }
 0x3c5   : > { %s938_s1 = smov %s934_s1  ;;  %s958_s27 = smov %s936_s27 }
 0x3c6   : > { %v952_v26 = vrot.slane %v951_v24, 2  ;;  %v971_v6 = vadd.f32 %v970_v25, %v969_v23  ;;  %s2200_s17 = scalar_lea.vmem [#allocation11], %s1840_s22  ;;  %s1034_s29 = scalar_lea.sflag [#allocation14], %s1834_s13 }
 0x3c7   : > { %s1039_s24 = scalar_lea.sflag [#allocation17], %s1834_s13  ;;  %s1049_s26 = scalar_lea.sflag [#allocation22], %s1834_s13 }
 0x3c8   : > { %v953_v7 = vadd.f32 %v952_v26, %v951_v24  ;;  %v972_v27 = vrot.slane %v971_v6, 2  ;;  %s1056_s25 = sshrl.u32 (%p1810_p3), %s1795_s12, 3  ;;  %s2201_s28 = scalar_lea.vmem (%p1810_p3), [#allocation9], %s1840_s22 }
 0x3c9   : > { %s1510_s21 = sshll.u32 (%p1810_p3), %s1056_s25, 1 }
 0x3ca   : > { %v954_v28 = vrot.slane %v953_v7, 1  ;;  %v973_v29 = vadd.f32 %v972_v27, %v971_v6  ;;  %s1058_s15 = scalar_lea.vmem (%p1810_p3), %s2182_s4, %s1510_s21 }
 0x3cc   : > { %v955_v30 = vadd.f32 %v954_v28, %v953_v7  ;;  %v974_v31 = vrot.slane %v973_v29, 1 }
 0x3ce   : > { %956 = vst [vmem:[%s938_s1] sm:$0x1] %v955_v30  ;;  %v975_v32 = vadd.f32 %v974_v31, %v973_v29 }
 0x3d0   : > { %976 = vst [vmem:[%s958_s27] sm:$0x1] %v975_v32 }
 0x3d4   : > { %1055 = sbr.rel (!%p1810_p3) target bundleno = 991 (0x3df), region = 158 }
 0x3d5   : > { %v981_v33 = vld [vmem:[#allocation8] sm:$0x3] }
 0x3d6   : > { %984 = vst [vmem:[%s2199_s30] sm:$0x3] %v981_v33 }
 0x3d7   : > { %v989_v34 = vld [vmem:[#allocation10] sm:$0x3] }
 0x3d8   : > { %992 = vst [vmem:[%s2200_s17] sm:$0x3] %v989_v34 }
 0x3dd   : > { %v1075_v35 = vld [vmem:[%s2201_s28] sm:$0x3] }
 0x3de   : > { %1076 = vst [vmem:[%s1058_s15] sm:$0x3] %v1075_v35 }
 0x3df PF: > { %1094 = sbr.rel (!%p1810_p3) target bundleno = 999 (0x3e7), region = 192  ;;  %s1095_s16 = sshrl.u32 (%p1810_p3), %s1795_s12, 3 }
 0x3e0   : > { %s2202_s0 = scalar_lea.vmem (%p1810_p3), [#allocation11], %s1840_s22  ;;  %s1511_s1 = sshll.u32 (%p1810_p3), %s1095_s16, 1 }
 0x3e1   : > { %s1097_s17 = scalar_lea.vmem (%p1810_p3), %s2183_s5, %s1511_s1 }
 0x3e5   : > { %v1114_v36 = vld [vmem:[%s2202_s0] sm:$0x3] }
 0x3e6   : > { %1115 = vst [vmem:[%s1097_s17] sm:$0x3] %v1114_v36 }
 0x3e7 PF: > { %s2084_s25 = sshll.u32 %s1795_s12, 5  ;;  %s2203_s28 = scalar_lea.vmem [#allocation16], %s1838_s19 }
 0x3e8   : > { %s1147_s20 = sshll.u32 %s2203_s28, 4  ;;  %s1145_s18 = scalar_lea.hbm %s2185_s7, %s2084_s25  ;;  %s1148_s20 = int_to_ptr.vmem [resolvable:$true] %s1147_s20 }
 0x3e9   : > { %s1582_s22 = scalar_lea.vmem %s1148_s20, 32  ;;  %s1725_s15 = smov [#allocation16]  }
 0x3ea   : > { %p1583_p13 = scmp.ne.s32.totalorder %s1148_s20, %s1582_s22  ;;  %s1584_s16 = sshll.u32 %s1725_s15, 4  ;;  %s1585_s16 = int_to_ptr.vmem [resolvable:$false] %s1584_s16 }
 0x3eb   : > { %s1586_s0 = scalar_lea.vmem %s1585_s16, 64  ;;  %p1587_p0 = scmp.lt.s32.totalorder %s1148_s20, %s1585_s16 }
 0x3ec   : > { %p1588_p1 = scmp.lt.s32.totalorder %s1586_s0, %s1582_s22 }
 0x3ee   : > { %p1589_p2 = por %p1588_p1, %p1587_p0 }
 0x3f0   : > { %p1590_p3 = pnand %p1589_p2, %p1583_p13 }
 0x3f2   : > { %1593 = shalt.err (!%p1590_p3)
}
 0x3f3   : > { %s1594_s12 = scalar_lea.hbm %s1145_s18, 32  ;;  %s1596_s30 = scalar_lea.hbm %s2185_s7, 64 }
 0x3f4   : > { %p1595_p5 = scmp.ne.s32.totalorder %s1145_s18, %s1594_s12  ;;  %p1597_p6 = scmp.lt.s32.totalorder %s1145_s18, %s2185_s7 }
 0x3f5   : > { %p1598_p7 = scmp.lt.s32.totalorder %s1596_s30, %s1594_s12 }
 0x3f7   : > { %p1599_p8 = por %p1598_p7, %p1597_p6 }
 0x3f9   : > { %p1600_p9 = pnand %p1599_p8, %p1595_p5 }
 0x3fb   : > { %1603 = shalt.err (!%p1600_p9)
}
 0x3fc   : > { %1150 = dma.vmem_to_hbm [thread:$0]  %s1148_s20, 32, %s1145_s18, %s1039_s24  }
 0x3fd   : > { %s1135_s22 = scalar_lea.hbm %s2184_s6, %s2084_s25  ;;  %s2204_s15 = scalar_lea.vmem [#allocation13], %s1838_s19 }
 0x3fe   : > { %s1137_s16 = sshll.u32 %s2204_s15, 4  ;;  %s2110_s12 = scalar_lea.hbm %s2186_s8, %s2084_s25  ;;  %s1138_s16 = int_to_ptr.vmem [resolvable:$true] %s1137_s16 }
 0x3ff   : > { %s1604_s27 = scalar_lea.vmem %s1138_s16, 32  ;;  %s1726_s30 = smov [#allocation13]  }
 0x400   : > { %p1605_p10 = scmp.ne.s32.totalorder %s1138_s16, %s1604_s27  ;;  %s1606_s17 = sshll.u32 %s1726_s30, 4  ;;  %s1607_s17 = int_to_ptr.vmem [resolvable:$false] %s1606_s17 }
 0x401   : > { %s1608_s28 = scalar_lea.vmem %s1607_s17, 64  ;;  %p1609_p11 = scmp.lt.s32.totalorder %s1138_s16, %s1607_s17 }
 0x402   : > { %p1610_p12 = scmp.lt.s32.totalorder %s1608_s28, %s1604_s27 }
 0x404   : > { %p1611_p13 = por %p1610_p12, %p1609_p11 }
 0x406   : > { %p1612_p0 = pnand %p1611_p13, %p1605_p10 }
 0x408   : > { %1615 = shalt.err (!%p1612_p0)
}
 0x409   : > { %s1616_s20 = scalar_lea.hbm %s1135_s22, 32  ;;  %s1618_s23 = scalar_lea.hbm %s2184_s6, 64 }
 0x40a   : > { %p1617_p1 = scmp.ne.s32.totalorder %s1135_s22, %s1616_s20  ;;  %p1619_p2 = scmp.lt.s32.totalorder %s1135_s22, %s2184_s6 }
 0x40b   : > { %p1620_p3 = scmp.lt.s32.totalorder %s1618_s23, %s1616_s20 }
 0x40d   : > { %p1621_p5 = por %p1620_p3, %p1619_p2 }
 0x40f   : > { %p1622_p6 = pnand %p1621_p5, %p1617_p1 }
 0x411   : > { %1625 = shalt.err (!%p1622_p6)
}
 0x412   : > { %1140 = dma.vmem_to_hbm [thread:$0]  %s1138_s16, 32, %s1135_s22, %s1034_s29  }
 0x413   : > { %s2205_s1 = scalar_lea.vmem [#allocation19], %s1838_s19  ;;  %s2126_s28 = scalar_lea.hbm %s2187_s9, %s2084_s25 }
 0x414   : > { %s1157_s27 = sshll.u32 %s2205_s1, 4  ;;  %s2206_s18 = scalar_lea.vmem [#allocation21], %s1838_s19  ;;  %s1158_s27 = int_to_ptr.vmem [resolvable:$true] %s1157_s27 }
 0x415   : > { %s1167_s21 = sshll.u32 %s2206_s18, 4  ;;  %s1626_s20 = scalar_lea.vmem %s1158_s27, 32  ;;  %s1168_s21 = int_to_ptr.vmem [resolvable:$true] %s1167_s21 }
 0x416   : > { %p1627_p7 = scmp.ne.s32.totalorder %s1158_s27, %s1626_s20  ;;  %s1727_s23 = smov [#allocation19]  }
 0x417   : > { %s1628_s15 = sshll.u32 %s1727_s23, 4  ;;  %s1629_s15 = int_to_ptr.vmem [resolvable:$false] %s1628_s15 }
 0x418   : > { %s1630_s0 = scalar_lea.vmem %s1629_s15, 64  ;;  %p1631_p8 = scmp.lt.s32.totalorder %s1158_s27, %s1629_s15 }
 0x419   : > { %p1632_p9 = scmp.lt.s32.totalorder %s1630_s0, %s1626_s20 }
 0x41b   : > { %p1633_p10 = por %p1632_p9, %p1631_p8 }
 0x41d   : > { %p1634_p11 = pnand %p1633_p10, %p1627_p7 }
 0x41f   : > { %1637 = shalt.err (!%p1634_p11)
}
 0x420   : > { %s1638_s29 = scalar_lea.hbm %s2110_s12, 32  ;;  %s1640_s19 = scalar_lea.hbm %s2186_s8, 64 }
 0x421   : > { %p1639_p12 = scmp.ne.s32.totalorder %s2110_s12, %s1638_s29  ;;  %p1641_p13 = scmp.lt.s32.totalorder %s2110_s12, %s2186_s8 }
 0x422   : > { %p1642_p0 = scmp.lt.s32.totalorder %s1640_s19, %s1638_s29 }
 0x424   : > { %p1643_p1 = por %p1642_p0, %p1641_p13 }
 0x426   : > { %p1644_p2 = pnand %p1643_p1, %p1639_p12 }
 0x428   : > { %1647 = shalt.err (!%p1644_p2)
}
 0x429   : > { %1160 = dma.vmem_to_hbm [thread:$0]  %s1158_s27, 32, %s2110_s12, %s1039_s24  }
 0x42a   : > { %s1648_s30 = scalar_lea.vmem %s1168_s21, 32  ;;  %s1728_s17 = smov [#allocation21]  }
 0x42b   : > { %p1649_p3 = scmp.ne.s32.totalorder %s1168_s21, %s1648_s30  ;;  %s1650_s18 = sshll.u32 %s1728_s17, 4  ;;  %s1651_s18 = int_to_ptr.vmem [resolvable:$false] %s1650_s18 }
 0x42c   : > { %s1652_s20 = scalar_lea.vmem %s1651_s18, 64  ;;  %p1653_p5 = scmp.lt.s32.totalorder %s1168_s21, %s1651_s18 }
 0x42d   : > { %p1654_p6 = scmp.lt.s32.totalorder %s1652_s20, %s1648_s30 }
 0x42f   : > { %p1655_p7 = por %p1654_p6, %p1653_p5 }
 0x431   : > { %p1656_p8 = pnand %p1655_p7, %p1649_p3 }
 0x433   : > { %1659 = shalt.err (!%p1656_p8)
}
 0x434   : > { %s1660_s23 = scalar_lea.hbm %s2126_s28, 32  ;;  %s1662_s24 = scalar_lea.hbm %s2187_s9, 64 }
 0x435   : > { %p1661_p9 = scmp.ne.s32.totalorder %s2126_s28, %s1660_s23  ;;  %p1663_p10 = scmp.lt.s32.totalorder %s2126_s28, %s2187_s9 }
 0x436   : > { %p1664_p11 = scmp.lt.s32.totalorder %s1662_s24, %s1660_s23 }
 0x438   : > { %p1665_p12 = por %p1664_p11, %p1663_p10 }
 0x43a   : > { %p1666_p13 = pnand %p1665_p12, %p1661_p9 }
 0x43c   : > { %1669 = shalt.err (!%p1666_p13)
}
 0x43d   : > { %1170 = dma.vmem_to_hbm [thread:$0]  %s1168_s21, 32, %s2126_s28, %s1049_s26  }
 0x43e PF: > { %s2207_s29 = sadd.s32 4294967294, %s1712_s11  }
 0x43f   : > { %s1190_s25 = sand.u32 1, %s2207_s29  }
 0x440   : > { %s1191_s22 = scalar_lea.sflag [#allocation14], %s1190_s25 }
 0x441   : > { %1691 = dma.done.wait (%p1468_p4), %s1191_s22, 32  }
 0x442   : > { %1693 = vsyncadd (%p1468_p4), %s1191_s22, 4294967264  ;;  %s1197_s19 = scalar_lea.sflag [#allocation17], %s1190_s25 }
 0x443   : > { %1695 = dma.done.wait (%p1468_p4), %s1197_s19, 64  }
 0x444   : > { %1697 = vsyncadd (%p1468_p4), %s1197_s19, 4294967232  ;;  %s1209_s13 = scalar_lea.sflag [#allocation22], %s1190_s25 }
 0x445   : > { %1699 = dma.done.wait (%p1468_p4), %s1209_s13, 32  }
 0x446   : > { %1701 = vsyncadd (%p1468_p4), %s1209_s13, 4294967264  ;;  %s2208_s26 = sld [smem:[#allocation39_spill]]  ;;  %p22_p0 = scmp.ge.s32.totalorder %s1799_s14, 4  }
 0x447   : > { %s2209_s30 = smov %s1708_s10  ;;  %s2211_s11 = smov %s1799_s14 }
 0x448   :  { %24 = sbr.rel (!%p22_p0) target bundleno = 10 (0xa), region = 366 }
 0x44c   : > { %s2210_s10 = smov %s2208_s26 }
 0x44d   :  { %1214 = vsyncpa [#allocation14], 1 }
 0x44e   :  { %1216 = vsyncpa [#allocation14 + $0x1], 1 }
 0x44f   :  { %1217 = vsyncpa [#allocation17], 1 }
 0x450   :  { %1219 = vsyncpa [#allocation17 + $0x1], 1 }
 0x451   :  { %1220 = vsyncpa [#allocation22], 1 }
 0x452   :  { %1222 = vsyncpa [#allocation22 + $0x1], 1 }

</bundles_post_ra>
